<compile_context>
chip_gen: v7x
topology: tpu7x:2x2x1
jax: 0.10.0
libtpu: 0.0.40
codegen_flags: <defaults>
</compile_context>

<pallas_src>
import jax
import jax.numpy as jnp
import numpy as np
from jax import lax
from jax.experimental import pallas as pl
from jax.experimental.pallas import tpu as pltpu

VMEM_SPEC = pl.BlockSpec(memory_space=pltpu.MemorySpace.VMEM)


# ----------------------------- fused Pallas kernel -----------------------------

def _blstm_kernel(x_ref, wih_ref, b_ref, mask_ref, whh_ref,
                  w1_ref, b1_ref, w2_ref, b2_ref, w3_ref, b3_ref,
                  o_ref, proj_ref):
    """Fused bidirectional LSTM (merged-direction layout) + 3-layer MLP head.

    x_ref:    (T*B, I)   time-major flattened input.
    wih_ref:  (I, 8H)    dense input->gate weights, interleaved [i_f|i_b|f_f|f_b|g_f|g_b|o_f|o_b].
    b_ref:    (1, 8H)    combined bias, same interleaved layout.
    mask_ref: (1, 8H)    1.0 on forward-direction lanes, 0.0 on backward lanes.
    whh_ref:  (2H, 8H)   block-diagonal recurrent weights (rows 0:H = h_f, H:2H = h_b).
    o_ref:    (B, C)     final logits.
    proj_ref: (T*B, 8H)  scratch: hoisted input projection (bias folded).
    """
    TB, _ = x_ref.shape
    H2 = whh_ref.shape[0]          # 2H (=128 lane-dense)
    H = H2 // 2
    B = o_ref.shape[0]
    T = TB // B

    # ---- hoisted input projection: one dense (T*B, I) @ (I, 8H) matmul, bias folded ----
    proj_ref[...] = (jnp.dot(x_ref[...], wih_ref[...],
                             preferred_element_type=jnp.float32) + b_ref[...])

    fwd_mask = mask_ref[...] > 0.5                 # (1, 8H) bool, broadcast over sublanes

    h = jnp.zeros((B, H2), jnp.float32)            # [h_f | h_b]
    c = jnp.zeros((B, H2), jnp.float32)            # [c_f | c_b]
    h_bwd_first = h

    # ---- merged bidirectional recurrence, fully unrolled (T is static) ----
    for t in range(T):
        # forward lanes consume proj[x[t]]; backward lanes consume proj[x[T-1-t]]
        p_fwd = proj_ref[t * B:(t + 1) * B, :]
        p_bwd = proj_ref[(T - 1 - t) * B:(T - t) * B, :]
        g_in = jnp.where(fwd_mask, p_fwd, p_bwd)
        if t == 0:
            gates = g_in                           # h == 0: skip the recurrent matmul
        else:
            gates = g_in + jnp.dot(h, whh_ref[...],
                                   preferred_element_type=jnp.float32)
        # each gate chunk is a lane-dense 2H = 128-wide slice covering both directions
        i_g = jax.nn.sigmoid(gates[:, 0 * H2:1 * H2])
        f_g = jax.nn.sigmoid(gates[:, 1 * H2:2 * H2])
        g_g = jnp.tanh(gates[:, 2 * H2:3 * H2])
        o_g = jax.nn.sigmoid(gates[:, 3 * H2:4 * H2])
        c = f_g * c + i_g * g_g
        h = o_g * jnp.tanh(c)
        if t == 0:
            h_bwd_first = h                        # backward half == out_b at position T-1

    # out[:, -1, :] = [ h_fwd after step T-1 | h_bwd after its first step ]
    # first 2H lanes of the mask are exactly [1]*H ++ [0]*H
    last = jnp.where(mask_ref[:, :H2] > 0.5, h, h_bwd_first)

    # ---- fused MLP head ----
    # TODO(synk): nn.Dropout is eval-mode identity here (train-mode masking omitted).
    z = jnp.maximum(last, 0.0)                     # relu(out)[:, -1, :] == relu(out[:, -1, :])
    z = jnp.dot(z, w1_ref[...], preferred_element_type=jnp.float32) + b1_ref[...]
    z = jnp.maximum(z, 0.0)
    z = jnp.dot(z, w2_ref[...], preferred_element_type=jnp.float32) + b2_ref[...]
    z = jnp.dot(z, w3_ref[...], preferred_element_type=jnp.float32) + b3_ref[...]
    o_ref[...] = z.astype(o_ref.dtype)


# ----------------------------- wrapper -----------------------------

def blstm_forward(x, kp):
    """x: (B, T, input_size) batch-first float32. kp: packed kernel params."""
    B, T, I = x.shape
    C = kp["w3"].shape[1]
    G = kp["wih"].shape[1]                        # 8H
    # time-major, flattened so the kernel does one input-projection matmul
    x2 = jnp.transpose(x, (1, 0, 2)).reshape(T * B, I).astype(jnp.float32)

    return pl.pallas_call(
        _blstm_kernel,
        out_shape=jax.ShapeDtypeStruct((B, C), jnp.float32),
        in_specs=[VMEM_SPEC] * 11,
        out_specs=VMEM_SPEC,
        scratch_shapes=[pltpu.VMEM((T * B, G), jnp.float32)],   # hoisted projection
    )(x2, kp["wih"], kp["b"], kp["mask"], kp["whh"],
      kp["w1"], kp["b1"], kp["w2"], kp["b2"], kp["w3"], kp["b3"])


# ----------------------------- params, packing & reference -----------------------------

def init_params(key, input_size, hidden_size, num_class=1, fc_dim=300):
    """Per-direction PyTorch-style params (weights stored transposed: (in, out))."""
    ks = jax.random.split(key, 16)

    def u(k, shape, scale):
        return jax.random.uniform(k, shape, jnp.float32, -scale, scale)

    s = 1.0 / np.sqrt(hidden_size)
    p = {
        # LSTM weights: (in, 4H) / (H, 4H); gate order i, f, g, o
        "wih_f": u(ks[0], (input_size, 4 * hidden_size), s),
        "whh_f": u(ks[1], (hidden_size, 4 * hidden_size), s),
        "b_f":   u(ks[2], (1, 4 * hidden_size), s) + u(ks[3], (1, 4 * hidden_size), s),
        "wih_b": u(ks[4], (input_size, 4 * hidden_size), s),
        "whh_b": u(ks[5], (hidden_size, 4 * hidden_size), s),
        "b_b":   u(ks[6], (1, 4 * hidden_size), s) + u(ks[7], (1, 4 * hidden_size), s),
    }
    s1 = 1.0 / np.sqrt(2 * hidden_size)
    s2 = 1.0 / np.sqrt(fc_dim)
    p["w1"] = u(ks[8],  (2 * hidden_size, fc_dim), s1)
    p["b1"] = u(ks[9],  (1, fc_dim), s1)
    p["w2"] = u(ks[10], (fc_dim, fc_dim), s2)
    p["b2"] = u(ks[11], (1, fc_dim), s2)
    p["w3"] = u(ks[12], (fc_dim, num_class), s2)
    p["b3"] = u(ks[13], (1, num_class), s2)
    return p


def pack_params(p):
    """Repack per-direction params into the kernel's lane-dense merged layout."""
    H = p["whh_f"].shape[0]
    I = p["wih_f"].shape[0]
    G = 8 * H

    def interleave(af, ab):
        # (rows, 4H) x2 -> (rows, 8H) with per-gate [fwd H | bwd H] 2H-wide chunks
        rows = af.shape[0]
        return jnp.concatenate(
            [af.reshape(rows, 4, H), ab.reshape(rows, 4, H)], axis=-1).reshape(rows, G)

    # dense input->gate weights: fwd weights on fwd lanes, bwd weights on bwd lanes
    wih = interleave(p["wih_f"], p["wih_b"])                     # (I, 8H)
    b = interleave(p["b_f"], p["b_b"])                           # (1, 8H)

    # block-diagonal recurrent weights: h_f feeds fwd gate columns, h_b feeds bwd columns
    hf4 = p["whh_f"].reshape(H, 4, H)
    hb4 = p["whh_b"].reshape(H, 4, H)
    top = jnp.concatenate([hf4, jnp.zeros_like(hf4)], axis=-1).reshape(H, G)
    bot = jnp.concatenate([jnp.zeros_like(hb4), hb4], axis=-1).reshape(H, G)
    whh = jnp.concatenate([top, bot], axis=0)                    # (2H, 8H)

    # forward-lane mask: 1.0 where (col % 2H) < H
    cols = np.arange(G)
    mask = ((cols % (2 * H)) < H).astype(np.float32)[None, :]    # (1, 8H)

    # zero-pad fc width 300 -> next multiple of 128 (384): exact, lane-dense matmuls
    F = p["w1"].shape[1]
    Fp = ((F + 127) // 128) * 128
    pad = Fp - F
    return {
        "wih": wih, "b": b, "whh": whh, "mask": jnp.asarray(mask),
        "w1": jnp.pad(p["w1"], ((0, 0), (0, pad))),
        "b1": jnp.pad(p["b1"], ((0, 0), (0, pad))),
        "w2": jnp.pad(p["w2"], ((0, pad), (0, pad))),
        "b2": jnp.pad(p["b2"], ((0, 0), (0, pad))),
        "w3": jnp.pad(p["w3"], ((0, pad), (0, 0))),
        "b3": p["b3"],
    }


def ref_forward(x, p):
    """Pure-JAX reference matching the PyTorch module (eval-mode dropout)."""
    B, T, _ = x.shape
    H = p["whh_f"].shape[0]

    def run(wih, whh, b, xs):
        def step(carry, xt):
            h, c = carry
            g = xt @ wih + h @ whh + b
            i = jax.nn.sigmoid(g[:, :H])
            f = jax.nn.sigmoid(g[:, H:2 * H])
            gg = jnp.tanh(g[:, 2 * H:3 * H])
            o = jax.nn.sigmoid(g[:, 3 * H:])
            c = f * c + i * gg
            h = o * jnp.tanh(c)
            return (h, c), h
        init = (jnp.zeros((B, H), jnp.float32), jnp.zeros((B, H), jnp.float32))
        _, hs = lax.scan(step, init, xs)
        return hs  # (T, B, H)

    xs = jnp.transpose(x, (1, 0, 2))
    hf = run(p["wih_f"], p["whh_f"], p["b_f"][0], xs)
    hb = run(p["wih_b"], p["whh_b"], p["b_b"][0], xs[::-1])[::-1]
    out = jnp.concatenate([hf, hb], axis=-1)          # (T, B, 2H)
    last = jax.nn.relu(out[-1])
    h = jax.nn.relu(last @ p["w1"] + p["b1"][0])
    h = h @ p["w2"] + p["b2"][0]
    return h @ p["w3"] + p["b3"][0]


# ----------------------------- main -----------------------------

if __name__ == "__main__":
    # B=8 fills the sublane dim; H=64 makes 2H=128 (one lane-dense vreg per state).
    B, T, I, H, C = 8, 8, 16, 64, 1
    key = jax.random.PRNGKey(0)
    kx, kp = jax.random.split(key)
    x = jax.random.normal(kx, (B, T, I), jnp.float32)
    params = init_params(kp, input_size=I, hidden_size=H, num_class=C)
    kparams = pack_params(params)

    y = jax.jit(blstm_forward)(x, kparams)
    y = jax.block_until_ready(y)
    assert y.shape == (B, C)

    y_ref = ref_forward(x, params)
    np.testing.assert_allclose(np.asarray(y), np.asarray(y_ref), rtol=1e-4, atol=1e-4)

    print("KERNEL_OK")
</pallas_src>

<mosaic_0001>
module attributes {stable_mosaic.version = 11 : i64} {
  func.func @_blstm_kernel(%arg0: memref<64x16xf32, #tpu.memory_space<vmem>>, %arg1: memref<16x512xf32, #tpu.memory_space<vmem>>, %arg2: memref<1x512xf32, #tpu.memory_space<vmem>>, %arg3: memref<1x512xf32, #tpu.memory_space<vmem>>, %arg4: memref<128x512xf32, #tpu.memory_space<vmem>>, %arg5: memref<128x384xf32, #tpu.memory_space<vmem>>, %arg6: memref<1x384xf32, #tpu.memory_space<vmem>>, %arg7: memref<384x384xf32, #tpu.memory_space<vmem>>, %arg8: memref<1x384xf32, #tpu.memory_space<vmem>>, %arg9: memref<384x1xf32, #tpu.memory_space<vmem>>, %arg10: memref<1x1xf32, #tpu.memory_space<vmem>>, %arg11: memref<8x1xf32, #tpu.memory_space<vmem>>, %arg12: memref<64x512xf32, #tpu.memory_space<vmem>>) attributes {dimension_semantics = [], scalar_prefetch = 0 : i64, scratch_operands = 1 : i64, tpu.core_type = #tpu.core_type<tc>} {
    %c0 = arith.constant 0 : index
    %c0_0 = arith.constant 0 : index
    %0 = vector.load %arg0[%c0, %c0_0] : memref<64x16xf32, #tpu.memory_space<vmem>>, vector<64x16xf32>
    %c0_1 = arith.constant 0 : index
    %c0_2 = arith.constant 0 : index
    %1 = vector.load %arg1[%c0_1, %c0_2] : memref<16x512xf32, #tpu.memory_space<vmem>>, vector<16x512xf32>
    %cst = arith.constant dense<0.000000e+00> : vector<64x512xf32>
    %2 = tpu.matmul %0, %1, %cst {dimension_numbers = #tpu.dot_dimension_numbers<[1], [0], [0], [1], [0, 0, 1, 1], [], []>} : vector<64x16xf32>, vector<16x512xf32>, vector<64x512xf32> -> vector<64x512xf32>
    %c0_3 = arith.constant 0 : index
    %c0_4 = arith.constant 0 : index
    %3 = vector.load %arg2[%c0_3, %c0_4] : memref<1x512xf32, #tpu.memory_space<vmem>>, vector<1x512xf32>
    %4 = vector.broadcast %3 : vector<1x512xf32> to vector<64x512xf32>
    %5 = arith.addf %2, %4 : vector<64x512xf32>
    %c0_5 = arith.constant 0 : index
    %c0_6 = arith.constant 0 : index
    %6 = vector.load %arg12[%c0_5, %c0_6] : memref<64x512xf32, #tpu.memory_space<vmem>>, vector<64x512xf32>
    tpu.vector_store %arg12[%c0_5, %c0_6], %5 {strides = array<i32>} : memref<64x512xf32, #tpu.memory_space<vmem>>, vector<64x512xf32>,
    %c0_7 = arith.constant 0 : index
    %c0_8 = arith.constant 0 : index
    %7 = vector.load %arg3[%c0_7, %c0_8] : memref<1x512xf32, #tpu.memory_space<vmem>>, vector<1x512xf32>
    %cst_9 = arith.constant 5.000000e-01 : f32
    %8 = vector.broadcast %cst_9 : f32 to vector<1x512xf32>
    %9 = arith.cmpf ogt, %7, %8 : vector<1x512xf32>
    %cst_10 = arith.constant 0.000000e+00 : f32
    %10 = vector.broadcast %cst_10 : f32 to vector<8x128xf32>
    %c0_11 = arith.constant 0 : index
    %c0_12 = arith.constant 0 : index
    %11 = vector.load %arg12[%c0_11, %c0_12] : memref<64x512xf32, #tpu.memory_space<vmem>>, vector<8x512xf32>
    %c56 = arith.constant 56 : index
    %c0_13 = arith.constant 0 : index
    %12 = vector.load %arg12[%c56, %c0_13] : memref<64x512xf32, #tpu.memory_space<vmem>>, vector<8x512xf32>
    %13 = vector.shape_cast %9 : vector<1x512xi1> to vector<1x512xi1>
    %14 = vector.broadcast %13 : vector<1x512xi1> to vector<8x512xi1>
    %15 = arith.select %14, %11, %12 : vector<8x512xi1>, vector<8x512xf32>
    %16 = vector.extract_strided_slice %15 {offsets = [0, 0], sizes = [8, 128], strides = [1, 1]} : vector<8x512xf32> to vector<8x128xf32>
    %17 = arith.negf %16 : vector<8x128xf32>
    %18 = math.exp %17 : vector<8x128xf32>
    %cst_14 = arith.constant 1.000000e+00 : f32
    %19 = vector.broadcast %cst_14 : f32 to vector<8x128xf32>
    %20 = arith.addf %19, %18 : vector<8x128xf32>
    %21 = arith.divf %19, %20 : vector<8x128xf32>
    %22 = vector.extract_strided_slice %15 {offsets = [0, 128], sizes = [8, 128], strides = [1, 1]} : vector<8x512xf32> to vector<8x128xf32>
    %23 = arith.negf %22 : vector<8x128xf32>
    %24 = math.exp %23 : vector<8x128xf32>
    %cst_15 = arith.constant 1.000000e+00 : f32
    %25 = vector.broadcast %cst_15 : f32 to vector<8x128xf32>
    %26 = arith.addf %25, %24 : vector<8x128xf32>
    %27 = arith.divf %25, %26 : vector<8x128xf32>
    %28 = vector.extract_strided_slice %15 {offsets = [0, 256], sizes = [8, 128], strides = [1, 1]} : vector<8x512xf32> to vector<8x128xf32>
    %29 = math.tanh %28 : vector<8x128xf32>
    %30 = vector.extract_strided_slice %15 {offsets = [0, 384], sizes = [8, 128], strides = [1, 1]} : vector<8x512xf32> to vector<8x128xf32>
    %31 = arith.negf %30 : vector<8x128xf32>
    %32 = math.exp %31 : vector<8x128xf32>
    %cst_16 = arith.constant 1.000000e+00 : f32
    %33 = vector.broadcast %cst_16 : f32 to vector<8x128xf32>
    %34 = arith.addf %33, %32 : vector<8x128xf32>
    %35 = arith.divf %33, %34 : vector<8x128xf32>
    %36 = arith.mulf %27, %10 : vector<8x128xf32>
    %37 = arith.mulf %21, %29 : vector<8x128xf32>
    %38 = arith.addf %36, %37 : vector<8x128xf32>
    %39 = math.tanh %38 : vector<8x128xf32>
    %40 = arith.mulf %35, %39 : vector<8x128xf32>
    %c8 = arith.constant 8 : index
    %c0_17 = arith.constant 0 : index
    %41 = vector.load %arg12[%c8, %c0_17] : memref<64x512xf32, #tpu.memory_space<vmem>>, vector<8x512xf32>
    %c48 = arith.constant 48 : index
    %c0_18 = arith.constant 0 : index
    %42 = vector.load %arg12[%c48, %c0_18] : memref<64x512xf32, #tpu.memory_space<vmem>>, vector<8x512xf32>
    %43 = vector.shape_cast %9 : vector<1x512xi1> to vector<1x512xi1>
    %44 = vector.broadcast %43 : vector<1x512xi1> to vector<8x512xi1>
    %45 = arith.select %44, %41, %42 : vector<8x512xi1>, vector<8x512xf32>
    %c0_19 = arith.constant 0 : index
    %c0_20 = arith.constant 0 : index
    %46 = vector.load %arg4[%c0_19, %c0_20] : memref<128x512xf32, #tpu.memory_space<vmem>>, vector<128x512xf32>
    %cst_21 = arith.constant dense<0.000000e+00> : vector<8x512xf32>
    %47 = tpu.matmul %40, %46, %cst_21 {dimension_numbers = #tpu.dot_dimension_numbers<[1], [0], [0], [1], [0, 0, 1, 1], [], []>} : vector<8x128xf32>, vector<128x512xf32>, vector<8x512xf32> -> vector<8x512xf32>
    %48 = arith.addf %45, %47 : vector<8x512xf32>
    %49 = vector.extract_strided_slice %48 {offsets = [0, 0], sizes = [8, 128], strides = [1, 1]} : vector<8x512xf32> to vector<8x128xf32>
    %50 = arith.negf %49 : vector<8x128xf32>
    %51 = math.exp %50 : vector<8x128xf32>
    %cst_22 = arith.constant 1.000000e+00 : f32
    %52 = vector.broadcast %cst_22 : f32 to vector<8x128xf32>
    %53 = arith.addf %52, %51 : vector<8x128xf32>
    %54 = arith.divf %52, %53 : vector<8x128xf32>
    %55 = vector.extract_strided_slice %48 {offsets = [0, 128], sizes = [8, 128], strides = [1, 1]} : vector<8x512xf32> to vector<8x128xf32>
    %56 = arith.negf %55 : vector<8x128xf32>
    %57 = math.exp %56 : vector<8x128xf32>
    %cst_23 = arith.constant 1.000000e+00 : f32
    %58 = vector.broadcast %cst_23 : f32 to vector<8x128xf32>
    %59 = arith.addf %58, %57 : vector<8x128xf32>
    %60 = arith.divf %58, %59 : vector<8x128xf32>
    %61 = vector.extract_strided_slice %48 {offsets = [0, 256], sizes = [8, 128], strides = [1, 1]} : vector<8x512xf32> to vector<8x128xf32>
    %62 = math.tanh %61 : vector<8x128xf32>
    %63 = vector.extract_strided_slice %48 {offsets = [0, 384], sizes = [8, 128], strides = [1, 1]} : vector<8x512xf32> to vector<8x128xf32>
    %64 = arith.negf %63 : vector<8x128xf32>
    %65 = math.exp %64 : vector<8x128xf32>
    %cst_24 = arith.constant 1.000000e+00 : f32
    %66 = vector.broadcast %cst_24 : f32 to vector<8x128xf32>
    %67 = arith.addf %66, %65 : vector<8x128xf32>
    %68 = arith.divf %66, %67 : vector<8x128xf32>
    %69 = arith.mulf %60, %38 : vector<8x128xf32>
    %70 = arith.mulf %54, %62 : vector<8x128xf32>
    %71 = arith.addf %69, %70 : vector<8x128xf32>
    %72 = math.tanh %71 : vector<8x128xf32>
    %73 = arith.mulf %68, %72 : vector<8x128xf32>
    %c16 = arith.constant 16 : index
    %c0_25 = arith.constant 0 : index
    %74 = vector.load %arg12[%c16, %c0_25] : memref<64x512xf32, #tpu.memory_space<vmem>>, vector<8x512xf32>
    %c40 = arith.constant 40 : index
    %c0_26 = arith.constant 0 : index
    %75 = vector.load %arg12[%c40, %c0_26] : memref<64x512xf32, #tpu.memory_space<vmem>>, vector<8x512xf32>
    %76 = vector.shape_cast %9 : vector<1x512xi1> to vector<1x512xi1>
    %77 = vector.broadcast %76 : vector<1x512xi1> to vector<8x512xi1>
    %78 = arith.select %77, %74, %75 : vector<8x512xi1>, vector<8x512xf32>
    %c0_27 = arith.constant 0 : index
    %c0_28 = arith.constant 0 : index
    %79 = vector.load %arg4[%c0_27, %c0_28] : memref<128x512xf32, #tpu.memory_space<vmem>>, vector<128x512xf32>
    %cst_29 = arith.constant dense<0.000000e+00> : vector<8x512xf32>
    %80 = tpu.matmul %73, %79, %cst_29 {dimension_numbers = #tpu.dot_dimension_numbers<[1], [0], [0], [1], [0, 0, 1, 1], [], []>} : vector<8x128xf32>, vector<128x512xf32>, vector<8x512xf32> -> vector<8x512xf32>
    %81 = arith.addf %78, %80 : vector<8x512xf32>
    %82 = vector.extract_strided_slice %81 {offsets = [0, 0], sizes = [8, 128], strides = [1, 1]} : vector<8x512xf32> to vector<8x128xf32>
    %83 = arith.negf %82 : vector<8x128xf32>
    %84 = math.exp %83 : vector<8x128xf32>
    %cst_30 = arith.constant 1.000000e+00 : f32
    %85 = vector.broadcast %cst_30 : f32 to vector<8x128xf32>
    %86 = arith.addf %85, %84 : vector<8x128xf32>
    %87 = arith.divf %85, %86 : vector<8x128xf32>
    %88 = vector.extract_strided_slice %81 {offsets = [0, 128], sizes = [8, 128], strides = [1, 1]} : vector<8x512xf32> to vector<8x128xf32>
    %89 = arith.negf %88 : vector<8x128xf32>
    %90 = math.exp %89 : vector<8x128xf32>
    %cst_31 = arith.constant 1.000000e+00 : f32
    %91 = vector.broadcast %cst_31 : f32 to vector<8x128xf32>
    %92 = arith.addf %91, %90 : vector<8x128xf32>
    %93 = arith.divf %91, %92 : vector<8x128xf32>
    %94 = vector.extract_strided_slice %81 {offsets = [0, 256], sizes = [8, 128], strides = [1, 1]} : vector<8x512xf32> to vector<8x128xf32>
    %95 = math.tanh %94 : vector<8x128xf32>
    %96 = vector.extract_strided_slice %81 {offsets = [0, 384], sizes = [8, 128], strides = [1, 1]} : vector<8x512xf32> to vector<8x128xf32>
    %97 = arith.negf %96 : vector<8x128xf32>
    %98 = math.exp %97 : vector<8x128xf32>
    %cst_32 = arith.constant 1.000000e+00 : f32
    %99 = vector.broadcast %cst_32 : f32 to vector<8x128xf32>
    %100 = arith.addf %99, %98 : vector<8x128xf32>
    %101 = arith.divf %99, %100 : vector<8x128xf32>
    %102 = arith.mulf %93, %71 : vector<8x128xf32>
    %103 = arith.mulf %87, %95 : vector<8x128xf32>
    %104 = arith.addf %102, %103 : vector<8x128xf32>
    %105 = math.tanh %104 : vector<8x128xf32>
    %106 = arith.mulf %101, %105 : vector<8x128xf32>
    %c24 = arith.constant 24 : index
    %c0_33 = arith.constant 0 : index
    %107 = vector.load %arg12[%c24, %c0_33] : memref<64x512xf32, #tpu.memory_space<vmem>>, vector<8x512xf32>
    %c32 = arith.constant 32 : index
    %c0_34 = arith.constant 0 : index
    %108 = vector.load %arg12[%c32, %c0_34] : memref<64x512xf32, #tpu.memory_space<vmem>>, vector<8x512xf32>
    %109 = vector.shape_cast %9 : vector<1x512xi1> to vector<1x512xi1>
    %110 = vector.broadcast %109 : vector<1x512xi1> to vector<8x512xi1>
    %111 = arith.select %110, %107, %108 : vector<8x512xi1>, vector<8x512xf32>
    %c0_35 = arith.constant 0 : index
    %c0_36 = arith.constant 0 : index
    %112 = vector.load %arg4[%c0_35, %c0_36] : memref<128x512xf32, #tpu.memory_space<vmem>>, vector<128x512xf32>
    %cst_37 = arith.constant dense<0.000000e+00> : vector<8x512xf32>
    %113 = tpu.matmul %106, %112, %cst_37 {dimension_numbers = #tpu.dot_dimension_numbers<[1], [0], [0], [1], [0, 0, 1, 1], [], []>} : vector<8x128xf32>, vector<128x512xf32>, vector<8x512xf32> -> vector<8x512xf32>
    %114 = arith.addf %111, %113 : vector<8x512xf32>
    %115 = vector.extract_strided_slice %114 {offsets = [0, 0], sizes = [8, 128], strides = [1, 1]} : vector<8x512xf32> to vector<8x128xf32>
    %116 = arith.negf %115 : vector<8x128xf32>
    %117 = math.exp %116 : vector<8x128xf32>
    %cst_38 = arith.constant 1.000000e+00 : f32
    %118 = vector.broadcast %cst_38 : f32 to vector<8x128xf32>
    %119 = arith.addf %118, %117 : vector<8x128xf32>
    %120 = arith.divf %118, %119 : vector<8x128xf32>
    %121 = vector.extract_strided_slice %114 {offsets = [0, 128], sizes = [8, 128], strides = [1, 1]} : vector<8x512xf32> to vector<8x128xf32>
    %122 = arith.negf %121 : vector<8x128xf32>
    %123 = math.exp %122 : vector<8x128xf32>
    %cst_39 = arith.constant 1.000000e+00 : f32
    %124 = vector.broadcast %cst_39 : f32 to vector<8x128xf32>
    %125 = arith.addf %124, %123 : vector<8x128xf32>
    %126 = arith.divf %124, %125 : vector<8x128xf32>
    %127 = vector.extract_strided_slice %114 {offsets = [0, 256], sizes = [8, 128], strides = [1, 1]} : vector<8x512xf32> to vector<8x128xf32>
    %128 = math.tanh %127 : vector<8x128xf32>
    %129 = vector.extract_strided_slice %114 {offsets = [0, 384], sizes = [8, 128], strides = [1, 1]} : vector<8x512xf32> to vector<8x128xf32>
    %130 = arith.negf %129 : vector<8x128xf32>
    %131 = math.exp %130 : vector<8x128xf32>
    %cst_40 = arith.constant 1.000000e+00 : f32
    %132 = vector.broadcast %cst_40 : f32 to vector<8x128xf32>
    %133 = arith.addf %132, %131 : vector<8x128xf32>
    %134 = arith.divf %132, %133 : vector<8x128xf32>
    %135 = arith.mulf %126, %104 : vector<8x128xf32>
    %136 = arith.mulf %120, %128 : vector<8x128xf32>
    %137 = arith.addf %135, %136 : vector<8x128xf32>
    %138 = math.tanh %137 : vector<8x128xf32>
    %139 = arith.mulf %134, %138 : vector<8x128xf32>
    %c32_41 = arith.constant 32 : index
    %c0_42 = arith.constant 0 : index
    %140 = vector.load %arg12[%c32_41, %c0_42] : memref<64x512xf32, #tpu.memory_space<vmem>>, vector<8x512xf32>
    %c24_43 = arith.constant 24 : index
    %c0_44 = arith.constant 0 : index
    %141 = vector.load %arg12[%c24_43, %c0_44] : memref<64x512xf32, #tpu.memory_space<vmem>>, vector<8x512xf32>
    %142 = vector.shape_cast %9 : vector<1x512xi1> to vector<1x512xi1>
    %143 = vector.broadcast %142 : vector<1x512xi1> to vector<8x512xi1>
    %144 = arith.select %143, %140, %141 : vector<8x512xi1>, vector<8x512xf32>
    %c0_45 = arith.constant 0 : index
    %c0_46 = arith.constant 0 : index
    %145 = vector.load %arg4[%c0_45, %c0_46] : memref<128x512xf32, #tpu.memory_space<vmem>>, vector<128x512xf32>
    %cst_47 = arith.constant dense<0.000000e+00> : vector<8x512xf32>
    %146 = tpu.matmul %139, %145, %cst_47 {dimension_numbers = #tpu.dot_dimension_numbers<[1], [0], [0], [1], [0, 0, 1, 1], [], []>} : vector<8x128xf32>, vector<128x512xf32>, vector<8x512xf32> -> vector<8x512xf32>
    %147 = arith.addf %144, %146 : vector<8x512xf32>
    %148 = vector.extract_strided_slice %147 {offsets = [0, 0], sizes = [8, 128], strides = [1, 1]} : vector<8x512xf32> to vector<8x128xf32>
    %149 = arith.negf %148 : vector<8x128xf32>
    %150 = math.exp %149 : vector<8x128xf32>
    %cst_48 = arith.constant 1.000000e+00 : f32
    %151 = vector.broadcast %cst_48 : f32 to vector<8x128xf32>
    %152 = arith.addf %151, %150 : vector<8x128xf32>
    %153 = arith.divf %151, %152 : vector<8x128xf32>
    %154 = vector.extract_strided_slice %147 {offsets = [0, 128], sizes = [8, 128], strides = [1, 1]} : vector<8x512xf32> to vector<8x128xf32>
    %155 = arith.negf %154 : vector<8x128xf32>
    %156 = math.exp %155 : vector<8x128xf32>
    %cst_49 = arith.constant 1.000000e+00 : f32
    %157 = vector.broadcast %cst_49 : f32 to vector<8x128xf32>
    %158 = arith.addf %157, %156 : vector<8x128xf32>
    %159 = arith.divf %157, %158 : vector<8x128xf32>
    %160 = vector.extract_strided_slice %147 {offsets = [0, 256], sizes = [8, 128], strides = [1, 1]} : vector<8x512xf32> to vector<8x128xf32>
    %161 = math.tanh %160 : vector<8x128xf32>
    %162 = vector.extract_strided_slice %147 {offsets = [0, 384], sizes = [8, 128], strides = [1, 1]} : vector<8x512xf32> to vector<8x128xf32>
    %163 = arith.negf %162 : vector<8x128xf32>
    %164 = math.exp %163 : vector<8x128xf32>
    %cst_50 = arith.constant 1.000000e+00 : f32
    %165 = vector.broadcast %cst_50 : f32 to vector<8x128xf32>
    %166 = arith.addf %165, %164 : vector<8x128xf32>
    %167 = arith.divf %165, %166 : vector<8x128xf32>
    %168 = arith.mulf %159, %137 : vector<8x128xf32>
    %169 = arith.mulf %153, %161 : vector<8x128xf32>
    %170 = arith.addf %168, %169 : vector<8x128xf32>
    %171 = math.tanh %170 : vector<8x128xf32>
    %172 = arith.mulf %167, %171 : vector<8x128xf32>
    %c40_51 = arith.constant 40 : index
    %c0_52 = arith.constant 0 : index
    %173 = vector.load %arg12[%c40_51, %c0_52] : memref<64x512xf32, #tpu.memory_space<vmem>>, vector<8x512xf32>
    %c16_53 = arith.constant 16 : index
    %c0_54 = arith.constant 0 : index
    %174 = vector.load %arg12[%c16_53, %c0_54] : memref<64x512xf32, #tpu.memory_space<vmem>>, vector<8x512xf32>
    %175 = vector.shape_cast %9 : vector<1x512xi1> to vector<1x512xi1>
    %176 = vector.broadcast %175 : vector<1x512xi1> to vector<8x512xi1>
    %177 = arith.select %176, %173, %174 : vector<8x512xi1>, vector<8x512xf32>
    %c0_55 = arith.constant 0 : index
    %c0_56 = arith.constant 0 : index
    %178 = vector.load %arg4[%c0_55, %c0_56] : memref<128x512xf32, #tpu.memory_space<vmem>>, vector<128x512xf32>
    %cst_57 = arith.constant dense<0.000000e+00> : vector<8x512xf32>
    %179 = tpu.matmul %172, %178, %cst_57 {dimension_numbers = #tpu.dot_dimension_numbers<[1], [0], [0], [1], [0, 0, 1, 1], [], []>} : vector<8x128xf32>, vector<128x512xf32>, vector<8x512xf32> -> vector<8x512xf32>
    %180 = arith.addf %177, %179 : vector<8x512xf32>
    %181 = vector.extract_strided_slice %180 {offsets = [0, 0], sizes = [8, 128], strides = [1, 1]} : vector<8x512xf32> to vector<8x128xf32>
    %182 = arith.negf %181 : vector<8x128xf32>
    %183 = math.exp %182 : vector<8x128xf32>
    %cst_58 = arith.constant 1.000000e+00 : f32
    %184 = vector.broadcast %cst_58 : f32 to vector<8x128xf32>
    %185 = arith.addf %184, %183 : vector<8x128xf32>
    %186 = arith.divf %184, %185 : vector<8x128xf32>
    %187 = vector.extract_strided_slice %180 {offsets = [0, 128], sizes = [8, 128], strides = [1, 1]} : vector<8x512xf32> to vector<8x128xf32>
    %188 = arith.negf %187 : vector<8x128xf32>
    %189 = math.exp %188 : vector<8x128xf32>
    %cst_59 = arith.constant 1.000000e+00 : f32
    %190 = vector.broadcast %cst_59 : f32 to vector<8x128xf32>
    %191 = arith.addf %190, %189 : vector<8x128xf32>
    %192 = arith.divf %190, %191 : vector<8x128xf32>
    %193 = vector.extract_strided_slice %180 {offsets = [0, 256], sizes = [8, 128], strides = [1, 1]} : vector<8x512xf32> to vector<8x128xf32>
    %194 = math.tanh %193 : vector<8x128xf32>
    %195 = vector.extract_strided_slice %180 {offsets = [0, 384], sizes = [8, 128], strides = [1, 1]} : vector<8x512xf32> to vector<8x128xf32>
    %196 = arith.negf %195 : vector<8x128xf32>
    %197 = math.exp %196 : vector<8x128xf32>
    %cst_60 = arith.constant 1.000000e+00 : f32
    %198 = vector.broadcast %cst_60 : f32 to vector<8x128xf32>
    %199 = arith.addf %198, %197 : vector<8x128xf32>
    %200 = arith.divf %198, %199 : vector<8x128xf32>
    %201 = arith.mulf %192, %170 : vector<8x128xf32>
    %202 = arith.mulf %186, %194 : vector<8x128xf32>
    %203 = arith.addf %201, %202 : vector<8x128xf32>
    %204 = math.tanh %203 : vector<8x128xf32>
    %205 = arith.mulf %200, %204 : vector<8x128xf32>
    %c48_61 = arith.constant 48 : index
    %c0_62 = arith.constant 0 : index
    %206 = vector.load %arg12[%c48_61, %c0_62] : memref<64x512xf32, #tpu.memory_space<vmem>>, vector<8x512xf32>
    %c8_63 = arith.constant 8 : index
    %c0_64 = arith.constant 0 : index
    %207 = vector.load %arg12[%c8_63, %c0_64] : memref<64x512xf32, #tpu.memory_space<vmem>>, vector<8x512xf32>
    %208 = vector.shape_cast %9 : vector<1x512xi1> to vector<1x512xi1>
    %209 = vector.broadcast %208 : vector<1x512xi1> to vector<8x512xi1>
    %210 = arith.select %209, %206, %207 : vector<8x512xi1>, vector<8x512xf32>
    %c0_65 = arith.constant 0 : index
    %c0_66 = arith.constant 0 : index
    %211 = vector.load %arg4[%c0_65, %c0_66] : memref<128x512xf32, #tpu.memory_space<vmem>>, vector<128x512xf32>
    %cst_67 = arith.constant dense<0.000000e+00> : vector<8x512xf32>
    %212 = tpu.matmul %205, %211, %cst_67 {dimension_numbers = #tpu.dot_dimension_numbers<[1], [0], [0], [1], [0, 0, 1, 1], [], []>} : vector<8x128xf32>, vector<128x512xf32>, vector<8x512xf32> -> vector<8x512xf32>
    %213 = arith.addf %210, %212 : vector<8x512xf32>
    %214 = vector.extract_strided_slice %213 {offsets = [0, 0], sizes = [8, 128], strides = [1, 1]} : vector<8x512xf32> to vector<8x128xf32>
    %215 = arith.negf %214 : vector<8x128xf32>
    %216 = math.exp %215 : vector<8x128xf32>
    %cst_68 = arith.constant 1.000000e+00 : f32
    %217 = vector.broadcast %cst_68 : f32 to vector<8x128xf32>
    %218 = arith.addf %217, %216 : vector<8x128xf32>
    %219 = arith.divf %217, %218 : vector<8x128xf32>
    %220 = vector.extract_strided_slice %213 {offsets = [0, 128], sizes = [8, 128], strides = [1, 1]} : vector<8x512xf32> to vector<8x128xf32>
    %221 = arith.negf %220 : vector<8x128xf32>
    %222 = math.exp %221 : vector<8x128xf32>
    %cst_69 = arith.constant 1.000000e+00 : f32
    %223 = vector.broadcast %cst_69 : f32 to vector<8x128xf32>
    %224 = arith.addf %223, %222 : vector<8x128xf32>
    %225 = arith.divf %223, %224 : vector<8x128xf32>
    %226 = vector.extract_strided_slice %213 {offsets = [0, 256], sizes = [8, 128], strides = [1, 1]} : vector<8x512xf32> to vector<8x128xf32>
    %227 = math.tanh %226 : vector<8x128xf32>
    %228 = vector.extract_strided_slice %213 {offsets = [0, 384], sizes = [8, 128], strides = [1, 1]} : vector<8x512xf32> to vector<8x128xf32>
    %229 = arith.negf %228 : vector<8x128xf32>
    %230 = math.exp %229 : vector<8x128xf32>
    %cst_70 = arith.constant 1.000000e+00 : f32
    %231 = vector.broadcast %cst_70 : f32 to vector<8x128xf32>
    %232 = arith.addf %231, %230 : vector<8x128xf32>
    %233 = arith.divf %231, %232 : vector<8x128xf32>
    %234 = arith.mulf %225, %203 : vector<8x128xf32>
    %235 = arith.mulf %219, %227 : vector<8x128xf32>
    %236 = arith.addf %234, %235 : vector<8x128xf32>
    %237 = math.tanh %236 : vector<8x128xf32>
    %238 = arith.mulf %233, %237 : vector<8x128xf32>
    %c56_71 = arith.constant 56 : index
    %c0_72 = arith.constant 0 : index
    %239 = vector.load %arg12[%c56_71, %c0_72] : memref<64x512xf32, #tpu.memory_space<vmem>>, vector<8x512xf32>
    %c0_73 = arith.constant 0 : index
    %c0_74 = arith.constant 0 : index
    %240 = vector.load %arg12[%c0_73, %c0_74] : memref<64x512xf32, #tpu.memory_space<vmem>>, vector<8x512xf32>
    %241 = vector.shape_cast %9 : vector<1x512xi1> to vector<1x512xi1>
    %242 = vector.broadcast %241 : vector<1x512xi1> to vector<8x512xi1>
    %243 = arith.select %242, %239, %240 : vector<8x512xi1>, vector<8x512xf32>
    %c0_75 = arith.constant 0 : index
    %c0_76 = arith.constant 0 : index
    %244 = vector.load %arg4[%c0_75, %c0_76] : memref<128x512xf32, #tpu.memory_space<vmem>>, vector<128x512xf32>
    %cst_77 = arith.constant dense<0.000000e+00> : vector<8x512xf32>
    %245 = tpu.matmul %238, %244, %cst_77 {dimension_numbers = #tpu.dot_dimension_numbers<[1], [0], [0], [1], [0, 0, 1, 1], [], []>} : vector<8x128xf32>, vector<128x512xf32>, vector<8x512xf32> -> vector<8x512xf32>
    %246 = arith.addf %243, %245 : vector<8x512xf32>
    %247 = vector.extract_strided_slice %246 {offsets = [0, 0], sizes = [8, 128], strides = [1, 1]} : vector<8x512xf32> to vector<8x128xf32>
    %248 = arith.negf %247 : vector<8x128xf32>
    %249 = math.exp %248 : vector<8x128xf32>
    %cst_78 = arith.constant 1.000000e+00 : f32
    %250 = vector.broadcast %cst_78 : f32 to vector<8x128xf32>
    %251 = arith.addf %250, %249 : vector<8x128xf32>
    %252 = arith.divf %250, %251 : vector<8x128xf32>
    %253 = vector.extract_strided_slice %246 {offsets = [0, 128], sizes = [8, 128], strides = [1, 1]} : vector<8x512xf32> to vector<8x128xf32>
    %254 = arith.negf %253 : vector<8x128xf32>
    %255 = math.exp %254 : vector<8x128xf32>
    %cst_79 = arith.constant 1.000000e+00 : f32
    %256 = vector.broadcast %cst_79 : f32 to vector<8x128xf32>
    %257 = arith.addf %256, %255 : vector<8x128xf32>
    %258 = arith.divf %256, %257 : vector<8x128xf32>
    %259 = vector.extract_strided_slice %246 {offsets = [0, 256], sizes = [8, 128], strides = [1, 1]} : vector<8x512xf32> to vector<8x128xf32>
    %260 = math.tanh %259 : vector<8x128xf32>
    %261 = vector.extract_strided_slice %246 {offsets = [0, 384], sizes = [8, 128], strides = [1, 1]} : vector<8x512xf32> to vector<8x128xf32>
    %262 = arith.negf %261 : vector<8x128xf32>
    %263 = math.exp %262 : vector<8x128xf32>
    %cst_80 = arith.constant 1.000000e+00 : f32
    %264 = vector.broadcast %cst_80 : f32 to vector<8x128xf32>
    %265 = arith.addf %264, %263 : vector<8x128xf32>
    %266 = arith.divf %264, %265 : vector<8x128xf32>
    %267 = arith.mulf %258, %236 : vector<8x128xf32>
    %268 = arith.mulf %252, %260 : vector<8x128xf32>
    %269 = arith.addf %267, %268 : vector<8x128xf32>
    %270 = math.tanh %269 : vector<8x128xf32>
    %271 = arith.mulf %266, %270 : vector<8x128xf32>
    %c0_81 = arith.constant 0 : index
    %c0_82 = arith.constant 0 : index
    %272 = vector.load %arg3[%c0_81, %c0_82] : memref<1x512xf32, #tpu.memory_space<vmem>>, vector<1x128xf32>
    %cst_83 = arith.constant 5.000000e-01 : f32
    %273 = vector.broadcast %cst_83 : f32 to vector<1x128xf32>
    %274 = arith.cmpf ogt, %272, %273 : vector<1x128xf32>
    %275 = vector.shape_cast %274 : vector<1x128xi1> to vector<1x128xi1>
    %276 = vector.broadcast %275 : vector<1x128xi1> to vector<8x128xi1>
    %277 = arith.select %276, %271, %40 : vector<8x128xi1>, vector<8x128xf32>
    %cst_84 = arith.constant 0.000000e+00 : f32
    %278 = vector.broadcast %cst_84 : f32 to vector<8x128xf32>
    %279 = arith.maximumf %277, %278 : vector<8x128xf32>
    %c0_85 = arith.constant 0 : index
    %c0_86 = arith.constant 0 : index
    %280 = vector.load %arg5[%c0_85, %c0_86] : memref<128x384xf32, #tpu.memory_space<vmem>>, vector<128x384xf32>
    %cst_87 = arith.constant dense<0.000000e+00> : vector<8x384xf32>
    %281 = tpu.matmul %279, %280, %cst_87 {dimension_numbers = #tpu.dot_dimension_numbers<[1], [0], [0], [1], [0, 0, 1, 1], [], []>} : vector<8x128xf32>, vector<128x384xf32>, vector<8x384xf32> -> vector<8x384xf32>
    %c0_88 = arith.constant 0 : index
    %c0_89 = arith.constant 0 : index
    %282 = vector.load %arg6[%c0_88, %c0_89] : memref<1x384xf32, #tpu.memory_space<vmem>>, vector<1x384xf32>
    %283 = vector.broadcast %282 : vector<1x384xf32> to vector<8x384xf32>
    %284 = arith.addf %281, %283 : vector<8x384xf32>
    %cst_90 = arith.constant 0.000000e+00 : f32
    %285 = vector.broadcast %cst_90 : f32 to vector<8x384xf32>
    %286 = arith.maximumf %284, %285 : vector<8x384xf32>
    %c0_91 = arith.constant 0 : index
    %c0_92 = arith.constant 0 : index
    %287 = vector.load %arg7[%c0_91, %c0_92] : memref<384x384xf32, #tpu.memory_space<vmem>>, vector<384x384xf32>
    %cst_93 = arith.constant dense<0.000000e+00> : vector<8x384xf32>
    %288 = tpu.matmul %286, %287, %cst_93 {dimension_numbers = #tpu.dot_dimension_numbers<[1], [0], [0], [1], [0, 0, 1, 1], [], []>} : vector<8x384xf32>, vector<384x384xf32>, vector<8x384xf32> -> vector<8x384xf32>
    %c0_94 = arith.constant 0 : index
    %c0_95 = arith.constant 0 : index
    %289 = vector.load %arg8[%c0_94, %c0_95] : memref<1x384xf32, #tpu.memory_space<vmem>>, vector<1x384xf32>
    %290 = vector.broadcast %289 : vector<1x384xf32> to vector<8x384xf32>
    %291 = arith.addf %288, %290 : vector<8x384xf32>
    %c0_96 = arith.constant 0 : index
    %c0_97 = arith.constant 0 : index
    %292 = vector.load %arg9[%c0_96, %c0_97] : memref<384x1xf32, #tpu.memory_space<vmem>>, vector<384x1xf32>
    %cst_98 = arith.constant dense<0.000000e+00> : vector<8x1xf32>
    %293 = tpu.matmul %291, %292, %cst_98 {dimension_numbers = #tpu.dot_dimension_numbers<[1], [0], [0], [1], [0, 0, 1, 1], [], []>} : vector<8x384xf32>, vector<384x1xf32>, vector<8x1xf32> -> vector<8x1xf32>
    %c0_99 = arith.constant 0 : index
    %c0_100 = arith.constant 0 : index
    %294 = vector.load %arg10[%c0_99, %c0_100] : memref<1x1xf32, #tpu.memory_space<vmem>>, vector<1x1xf32>
    %295 = vector.broadcast %294 : vector<1x1xf32> to vector<8x1xf32>
    %296 = arith.addf %293, %295 : vector<8x1xf32>
    %c0_101 = arith.constant 0 : index
    %c0_102 = arith.constant 0 : index
    %297 = vector.load %arg11[%c0_101, %c0_102] : memref<8x1xf32, #tpu.memory_space<vmem>>, vector<8x1xf32>
    tpu.vector_store %arg11[%c0_101, %c0_102], %296 {strides = array<i32>} : memref<8x1xf32, #tpu.memory_space<vmem>>, vector<8x1xf32>,
    return
  }
}

</mosaic_0001>

<bundles_post_ra>
// kernel: blstm_forward.1
= control target key start
LH: loop header
LB: loop body
LE: loop exit
PB: predicated region body
PF: predicated region fallthrough
CT: control target
= control target key end

     0   :  { %s5111_s0 = inlined_call_operand.vmem [shape: f32[64,16], index: 0, kind: input, shape index: {}]   ;;  %s5112_s1 = inlined_call_operand.hbm [shape: f32[16,512], index: 1, kind: input, shape index: {}]   ;;  %s5113_s2 = inlined_call_operand.vmem [shape: f32[1,512], index: 2, kind: input, shape index: {}]   ;;  %s5114_s3 = inlined_call_operand.vmem [shape: f32[1,512], index: 3, kind: input, shape index: {}]   ;;  %s5115_s4 = inlined_call_operand.vmem [shape: f32[128,512], index: 4, kind: input, shape index: {}]   ;;  %s5116_s5 = inlined_call_operand.hbm [shape: f32[128,384], index: 5, kind: input, shape index: {}]   ;;  %s5117_s6 = inlined_call_operand.vmem [shape: f32[1,384], index: 6, kind: input, shape index: {}]   ;;  %s5118_s7 = inlined_call_operand.hbm [shape: f32[384,384], index: 7, kind: input, shape index: {}]   ;;  %s5119_s8 = inlined_call_operand.vmem [shape: f32[1,384], index: 8, kind: input, shape index: {}]   ;;  %s5120_s9 = inlined_call_operand.vmem [shape: f32[384,1], index: 9, kind: input, shape index: {}]   ;;  %s5121_s10 = inlined_call_operand.<no memory space> [shape: f32[1,1], index: 10, kind: input, shape index: {}]   ;;  %s5122_s11 = inlined_call_operand.vmem [shape: f32[8,1], index: 11, kind: output, shape index: {}]  }
   0x1   :  { %v16_v0 = vstv %s5121_s10 }
   0x2   :  { %17 = vst [vmem:[#allocation3] sm:$0x1] %v16_v0 }
   0x3   :  { %18 = vsyncpa [#allocation5], 0 }
   0x4   :  { %19 = vsyncpa [#allocation7], 0  ;;  %s3832_s19 = smov [#allocation6]   ;;  %s3762_s23 = scalar_lea.hbm %s5116_s5, 6144 }
   0x5   :  { %s45_s20 = sshll.u32 %s3832_s19, 4  ;;  %p3763_p0 = scmp.ne.s32.totalorder %s5116_s5, %s3762_s23  ;;  %s46_s20 = int_to_ptr.vmem [resolvable:$true] %s45_s20 }
   0x6   :  { %p3766_p1 = scmp.lt.u32.totalorder %s3762_s23, %s5116_s5 }
   0x8   :  { %p3768_p2 = pnand %p3766_p1, %p3763_p0 }
   0xa   :  { %3771 = shalt.err (!%p3768_p2)
}
   0xb   :  { %s3772_s10 = scalar_lea.vmem %s46_s20, 6144  ;;  %p3777_p4 = scmp.lt.s32.totalorder %s46_s20, %s46_s20 }
   0xc   :  { %p3773_p3 = scmp.ne.s32.totalorder %s46_s20, %s3772_s10  ;;  %p3778_p5 = scmp.lt.s32.totalorder %s3772_s10, %s3772_s10 }
   0xe   :  { %p3779_p6 = por %p3778_p5, %p3777_p4 }
  0x10   :  { %p3780_p7 = pnand %p3779_p6, %p3773_p3 }
  0x12   :  { %3783 = shalt.err (!%p3780_p7)
}
  0x13   :  { %s3833_s28 = smov 384   ;;  %s3834_s29 = smov 24  }
  0x14   :  { %51 = dma.hbm_to_vmem [thread:$0]  %s5116_s5, 6144, %s46_s20, [#allocation7], %s3833_s28, %s3833_s28, %s3834_s29  }
  0x15   :  { %s3835_s13 = smov [#allocation4]   ;;  %s3784_s17 = scalar_lea.hbm %s5112_s1, 1024 }
  0x16   :  { %s27_s14 = sshll.u32 %s3835_s13, 4  ;;  %p3785_p8 = scmp.ne.s32.totalorder %s5112_s1, %s3784_s17  ;;  %s28_s14 = int_to_ptr.vmem [resolvable:$true] %s27_s14 }
  0x17   :  { %p3788_p9 = scmp.lt.u32.totalorder %s3784_s17, %s5112_s1 }
  0x19   :  { %p3790_p10 = pnand %p3788_p9, %p3785_p8 }
  0x1b   :  { %3793 = shalt.err (!%p3790_p10)
}
  0x1c   :  { %s3794_s23 = scalar_lea.vmem %s28_s14, 1024  ;;  %p3799_p12 = scmp.lt.s32.totalorder %s28_s14, %s28_s14 }
  0x1d   :  { %p3795_p11 = scmp.ne.s32.totalorder %s28_s14, %s3794_s23  ;;  %p3800_p13 = scmp.lt.s32.totalorder %s3794_s23, %s3794_s23 }
  0x1f   :  { %p3801_p0 = por %p3800_p13, %p3799_p12 }
  0x21   :  { %p3802_p1 = pnand %p3801_p0, %p3795_p11 }
  0x23   :  { %3805 = shalt.err (!%p3802_p1)
}
  0x24   :  { %s3836_s5 = smov 512   ;;  %s3837_s20 = smov 32  }
  0x25   :  { %33 = dma.hbm_to_vmem [thread:$0]  %s5112_s1, 1024, %s28_s14, [#allocation5], %s3836_s5, %s3836_s5, %s3837_s20  }
  0x26   :  { %s3838_s26 = smov [#allocation8]   ;;  %s3806_s12 = scalar_lea.hbm %s5118_s7, 18432 }
  0x27   :  { %s59_s27 = sshll.u32 %s3838_s26, 4  ;;  %p3807_p2 = scmp.ne.s32.totalorder %s5118_s7, %s3806_s12  ;;  %s60_s27 = int_to_ptr.vmem [resolvable:$true] %s59_s27 }
  0x28   :  { %p3810_p3 = scmp.lt.u32.totalorder %s3806_s12, %s5118_s7 }
  0x2a   :  { %p3812_p4 = pnand %p3810_p3, %p3807_p2 }
  0x2c   :  { %3815 = shalt.err (!%p3812_p4)
}
  0x2d   :  { %s3816_s18 = scalar_lea.vmem %s60_s27, 18432  ;;  %p3821_p6 = scmp.lt.s32.totalorder %s60_s27, %s60_s27 }
  0x2e   :  { %p3817_p5 = scmp.ne.s32.totalorder %s60_s27, %s3816_s18  ;;  %p3822_p7 = scmp.lt.s32.totalorder %s3816_s18, %s3816_s18 }
  0x30   :  { %p3823_p8 = por %p3822_p7, %p3821_p6 }
  0x32   :  { %p3824_p9 = pnand %p3823_p8, %p3817_p5 }
  0x34   :  { %3827 = shalt.err (!%p3824_p9)
}
  0x35   :  { %65 = dma.hbm_to_vmem [thread:$0]  %s5118_s7, 18432, %s60_s27, [#allocation7], %s3833_s28, %s3833_s28, %s3834_s29  }
  0x36   :  { %3828 = dma.done.wait [#allocation5], 1024  }
  0x37   :  { %3829 = vsyncadd [#allocation5], 4294966272 }
  0x38   :  { %3830 = dma.done.wait [#allocation7], 24576  }
  0x39   :  { %3831 = vsyncadd [#allocation7], 4294942720  ;;  %v5124_v1 = vmov 0.0   ;;  %v90_v2 = vld [vmem:[#allocation4 + $0x8] sm:$0xff]  ;;  %v92_v4 = vld [vmem:[#allocation4 + $0x18] sm:$0xff]  ;;  %vm119_vm0 = vcmask 130048  }
  0x3a   :  { %208 = vmatprep.mubr.f32.mxu0 %v5124_v1  ;;  %321 = vmatprep.mubr.f32.mxu1 %v5124_v1  ;;  %v94_v3 = vld [vmem:[#allocation4 + $0x28] sm:$0xff]  ;;  %v96_v6 = vld [vmem:[#allocation4 + $0x38] sm:$0xff]  ;;  %v89_v7 = vld [vmem:[#allocation4] sm:$0xff]  ;;  %vm3842_vm6 = vmmov 0   ;;  %vm2624_vm9 = vcmask 7168  }
  0x3b   :  { %v2899_v5 = vpack.c.bf16 %v94_v3, %v90_v2  ;;  %v93_v8 = vld [vmem:[#allocation4 + $0x20] sm:$0xff]  ;;  %v2903_v9 = vpack.c.bf16 %v96_v6, %v92_v4  ;;  %v91_v11 = vld [vmem:[#allocation4 + $0x10] sm:$0xff] }
  0x3c   :  { %v2901_v10 = vpack.c.bf16 %v93_v8, %v89_v7  ;;  %v95_v12 = vld [vmem:[#allocation4 + $0x30] sm:$0xff]  ;;  %v81_v14 = vld [vmem:[%s5111_s0] sm:$0xff]  ;;  %v82_v15 = vld [vmem:[%s5111_s0 + $0x8] sm:$0xff] }
  0x3d   :  { %2900 = vmatprep.subr.bf16.mxu0 %v2899_v5  ;;  %v2905_v13 = vpack.c.bf16 %v95_v12, %v91_v11  ;;  %2904 = vmatprep.subr.bf16.mxu1 %v2903_v9  ;;  %v83_v16 = vld [vmem:[%s5111_s0 + $0x10] sm:$0xff]  ;;  %v84_v17 = vld [vmem:[%s5111_s0 + $0x18] sm:$0xff]  ;;  %v85_v18 = vld [vmem:[%s5111_s0 + $0x20] sm:$0xff] }
  0x3e   :  { %2902 = vmatpush1.bf16.msra.mxu0 %v2901_v10  ;;  %v86_v19 = vld [vmem:[%s5111_s0 + $0x28] sm:$0xff]  ;;  %v87_v20 = vld [vmem:[%s5111_s0 + $0x30] sm:$0xff]  ;;  %v88_v21 = vld [vmem:[%s5111_s0 + $0x38] sm:$0xff] }
  0x3f   :  { %2906 = vmatpush1.bf16.msra.mxu1 %v2905_v13  ;;  %v474_v22 = vld [vmem:[%s5115_s4 + $0x8] sm:$0xff]  ;;  %v476_v24 = vld [vmem:[%s5115_s4 + $0x18] sm:$0xff]  ;;  %v473_v26 = vld [vmem:[%s5115_s4] sm:$0xff] }
  0x40   :  { %v478_v23 = vld [vmem:[%s5115_s4 + $0x28] sm:$0xff]  ;;  %v477_v27 = vld [vmem:[%s5115_s4 + $0x20] sm:$0xff]  ;;  %v480_v28 = vld [vmem:[%s5115_s4 + $0x38] sm:$0xff] }
  0x41   :  { %2632 = vmatmul.mubr.msk.f32.vlgmr.msra.gmra.mrb[0].mxu0 %vm119_vm0, %v81_v14  ;;  %v4015_v25 = vpack.c.bf16 %v478_v23, %v474_v22  ;;  %v4026_v29 = vpack.c.bf16 %v477_v27, %v473_v26  ;;  %v4028_v30 = vpack.c.bf16 %v480_v28, %v476_v24  ;;  %v475_v31 = vld [vmem:[%s5115_s4 + $0x10] sm:$0xff]  ;;  %v482_v34 = vld [vmem:[%s5115_s4 + $0x48] sm:$0xff]  ;;  %v484_v36 = vld [vmem:[%s5115_s4 + $0x58] sm:$0xff] }
  0x42   :  { %2640 = vmatmul.mubr.msk.f32.vlgmr.msra.gmra.mrb[0].mxu1 %vm119_vm0, %v81_v14  ;;  %214 = vmatprep.mubr.f32.mxu0 %v5124_v1  ;;  %v479_v32 = vld [vmem:[%s5115_s4 + $0x30] sm:$0xff]  ;;  %v486_v35 = vld [vmem:[%s5115_s4 + $0x68] sm:$0xff]  ;;  %v481_v38 = vld [vmem:[%s5115_s4 + $0x40] sm:$0xff] }
  0x43   :  { %327 = vmatprep.mubr.f32.mxu1 %v5124_v1  ;;  %5167 = vst [vmem:[#allocation11_spill] sm:$0xff] %v4015_v25  ;;  %5168 = vst [vmem:[#allocation12_spill] sm:$0xff] %v4028_v30  ;;  %2908 = vmatprep.subr.bf16.mxu0 %v4015_v25  ;;  %v4037_v33 = vpack.c.bf16 %v479_v32, %v475_v31  ;;  %v4051_v37 = vpack.c.bf16 %v486_v35, %v482_v34  ;;  %v485_v39 = vld [vmem:[%s5115_s4 + $0x60] sm:$0xff]  ;;  %v488_v40 = vld [vmem:[%s5115_s4 + $0x78] sm:$0xff] }
  0x44   :  { %2910 = vmatpush1.bf16.msra.mxu0 %v4026_v29  ;;  %2940 = vmatprep.subr.bf16.mxu1 %v4028_v30  ;;  %v4062_v41 = vpack.c.bf16 %v485_v39, %v481_v38  ;;  %v4064_v42 = vpack.c.bf16 %v488_v40, %v484_v36  ;;  %v483_v43 = vld [vmem:[%s5115_s4 + $0x50] sm:$0xff]  ;;  %v490_v46 = vld [vmem:[%s5115_s4 + $0x88] sm:$0xff]  ;;  %v492_v48 = vld [vmem:[%s5115_s4 + $0x98] sm:$0xff] }
  0x45   :  { %2633 = vmatmul.mubr.msk.f32.gmra.mrb[2].mxu0 %vm119_vm0, %v82_v15  ;;  %2942 = vmatpush1.bf16.msra.mxu1 %v4037_v33  ;;  %v487_v44 = vld [vmem:[%s5115_s4 + $0x70] sm:$0xff]  ;;  %v494_v47 = vld [vmem:[%s5115_s4 + $0xa8] sm:$0xff]  ;;  %v489_v50 = vld [vmem:[%s5115_s4 + $0x80] sm:$0xff] }
  0x46   :  { %2641 = vmatmul.mubr.msk.f32.gmra.mrb[2].mxu1 %vm119_vm0, %v82_v15  ;;  %220 = vmatprep.mubr.f32.mxu0 %v5124_v1  ;;  %v4073_v45 = vpack.c.bf16 %v487_v44, %v483_v43  ;;  %v4087_v49 = vpack.c.bf16 %v494_v47, %v490_v46  ;;  %v493_v51 = vld [vmem:[%s5115_s4 + $0xa0] sm:$0xff]  ;;  %v496_v52 = vld [vmem:[%s5115_s4 + $0xb8] sm:$0xff]  ;;  %v491_v55 = vld [vmem:[%s5115_s4 + $0x90] sm:$0xff] }
  0x47   :  { %333 = vmatprep.mubr.f32.mxu1 %v5124_v1  ;;  %2912 = vmatprep.subr.bf16.mxu0 %v4051_v37  ;;  %v4098_v53 = vpack.c.bf16 %v493_v51, %v489_v50  ;;  %v4100_v54 = vpack.c.bf16 %v496_v52, %v492_v48  ;;  %v495_v56 = vld [vmem:[%s5115_s4 + $0xb0] sm:$0xff]  ;;  %v498_v58 = vld [vmem:[%s5115_s4 + $0xc8] sm:$0xff]  ;;  %v500_v60 = vld [vmem:[%s5115_s4 + $0xd8] sm:$0xff] }
  0x48   :  { %2914 = vmatpush1.bf16.msra.mxu0 %v4062_v41  ;;  %2944 = vmatprep.subr.bf16.mxu1 %v4064_v42  ;;  %v4109_v57 = vpack.c.bf16 %v495_v56, %v491_v55  ;;  %v502_v59 = vld [vmem:[%s5115_s4 + $0xe8] sm:$0xff]  ;;  %v497_v62 = vld [vmem:[%s5115_s4 + $0xc0] sm:$0xff]  ;;  %v504_v0 = vld [vmem:[%s5115_s4 + $0xf8] sm:$0xff] }
  0x49   :  { %2634 = vmatmul.mubr.msk.f32.gmra.mrb[4].mxu0 %vm119_vm0, %v83_v16  ;;  %2946 = vmatpush1.bf16.msra.mxu1 %v4073_v45  ;;  %v4123_v61 = vpack.c.bf16 %v502_v59, %v498_v58  ;;  %v501_v63 = vld [vmem:[%s5115_s4 + $0xe0] sm:$0xff]  ;;  %v4136_v3 = vpack.c.bf16 %v504_v0, %v500_v60  ;;  %v499_v4 = vld [vmem:[%s5115_s4 + $0xd0] sm:$0xff]  ;;  %v506_v7 = vld [vmem:[%s5115_s4 + $0x108] sm:$0xff] }
  0x4a   :  { %2642 = vmatmul.mubr.msk.f32.gmra.mrb[4].mxu1 %vm119_vm0, %v83_v16  ;;  %226 = vmatprep.mubr.f32.mxu0 %v5124_v1  ;;  %v4134_v2 = vpack.c.bf16 %v501_v63, %v497_v62  ;;  %v503_v5 = vld [vmem:[%s5115_s4 + $0xf0] sm:$0xff]  ;;  %v510_v8 = vld [vmem:[%s5115_s4 + $0x128] sm:$0xff]  ;;  %v508_v9 = vld [vmem:[%s5115_s4 + $0x118] sm:$0xff] }
  0x4b   :  { %339 = vmatprep.mubr.f32.mxu1 %v5124_v1  ;;  %2916 = vmatprep.subr.bf16.mxu0 %v4087_v49  ;;  %v4145_v6 = vpack.c.bf16 %v503_v5, %v499_v4  ;;  %v4159_v10 = vpack.c.bf16 %v510_v8, %v506_v7  ;;  %v505_v11 = vld [vmem:[%s5115_s4 + $0x100] sm:$0xff]  ;;  %v512_v13 = vld [vmem:[%s5115_s4 + $0x138] sm:$0xff]  ;;  %v507_v16 = vld [vmem:[%s5115_s4 + $0x110] sm:$0xff]  ;;  %v99_v8 = vlaneseq }
  0x4c   :  { %2918 = vmatpush1.bf16.msra.mxu0 %v4098_v53  ;;  %2948 = vmatprep.subr.bf16.mxu1 %v4100_v54  ;;  %v509_v12 = vld [vmem:[%s5115_s4 + $0x120] sm:$0xff]  ;;  %v4172_v15 = vpack.c.bf16 %v512_v13, %v508_v9  ;;  %v520_v26 = vld [vmem:[%s5115_s4 + $0x178] sm:$0xff]  ;;  %v515_v31 = vld [vmem:[%s5115_s4 + $0x150] sm:$0xff] }
  0x4d   :  { %2635 = vmatmul.mubr.msk.f32.gmra.mrb[6].mxu0 %vm119_vm0, %v84_v17  ;;  %2950 = vmatpush1.bf16.msra.mxu1 %v4109_v57  ;;  %v4170_v14 = vpack.c.bf16 %v509_v12, %v505_v11  ;;  %v513_v23 = vld [vmem:[%s5115_s4 + $0x140] sm:$0xff]  ;;  %v519_v32 = vld [vmem:[%s5115_s4 + $0x170] sm:$0xff]  ;;  %v522_v34 = vld [vmem:[%s5115_s4 + $0x188] sm:$0xff]  ;;  %v100_v9 = vshrl.u32 %v99_v8, 7 }
  0x4e   :  { %2643 = vmatmul.mubr.msk.f32.gmra.mrb[6].mxu1 %vm119_vm0, %v84_v17  ;;  %232 = vmatprep.mubr.f32.mxu0 %v5124_v1  ;;  %v511_v17 = vld [vmem:[%s5115_s4 + $0x130] sm:$0xff]  ;;  %v517_v24 = vld [vmem:[%s5115_s4 + $0x160] sm:$0xff]  ;;  %v4220_v35 = vpack.c.bf16 %v519_v32, %v515_v31  ;;  %v526_v36 = vld [vmem:[%s5115_s4 + $0x1a8] sm:$0xff] }
  0x4f   :  { %345 = vmatprep.mubr.f32.mxu1 %v5124_v1  ;;  %2920 = vmatprep.subr.bf16.mxu0 %v4123_v61  ;;  %v4206_v27 = vpack.c.bf16 %v517_v24, %v513_v23  ;;  %v521_v38 = vld [vmem:[%s5115_s4 + $0x180] sm:$0xff]  ;;  %v4233_v40 = vpack.c.bf16 %v526_v36, %v522_v34  ;;  %v524_v44 = vld [vmem:[%s5115_s4 + $0x198] sm:$0xff]  ;;  %v523_v47 = vld [vmem:[%s5115_s4 + $0x190] sm:$0xff]  ;;  %v4296_v11 = vsub.s32 0, %v100_v9 }
  0x50   :  { %2922 = vmatpush1.bf16.msra.mxu0 %v4134_v2  ;;  %2952 = vmatprep.subr.bf16.mxu1 %v4136_v3  ;;  %v525_v39 = vld [vmem:[%s5115_s4 + $0x1a0] sm:$0xff]  ;;  %v528_v46 = vld [vmem:[%s5115_s4 + $0x1b8] sm:$0xff]  ;;  %v527_v50 = vld [vmem:[%s5115_s4 + $0x1b0] sm:$0xff] }
  0x51   :  { %2636 = vmatmul.mubr.msk.f32.gmra.mrb[8].mxu0 %vm119_vm0, %v85_v18  ;;  %2954 = vmatpush1.bf16.msra.mxu1 %v4145_v6  ;;  %v4235_v43 = vpack.c.bf16 %v525_v39, %v521_v38  ;;  %v4247_v48 = vpack.c.bf16 %v528_v46, %v524_v44  ;;  %v530_v51 = vld [vmem:[%s5115_s4 + $0x1c8] sm:$0xff]  ;;  %v4259_v55 = vpack.c.bf16 %v527_v50, %v523_v47  ;;  %v529_v58 = vld [vmem:[%s5115_s4 + $0x1c0] sm:$0xff]  ;;  %v532_v60 = vld [vmem:[%s5115_s4 + $0x1d8] sm:$0xff] }
  0x52   :  { %2644 = vmatmul.mubr.msk.f32.gmra.mrb[8].mxu1 %vm119_vm0, %v85_v18  ;;  %238 = vmatprep.mubr.f32.mxu0 %v5124_v1  ;;  %v4181_v18 = vpack.c.bf16 %v511_v17, %v507_v16  ;;  %v534_v52 = vld [vmem:[%s5115_s4 + $0x1e8] sm:$0xff]  ;;  %v533_v59 = vld [vmem:[%s5115_s4 + $0x1e0] sm:$0xff]  ;;  %v536_v62 = vld [vmem:[%s5115_s4 + $0x1f8] sm:$0xff]  ;;  %5169 = vst [vmem:[#allocation13_spill] sm:$0xff] %v4296_v11  ;;  %v4303_v16 = vsub.s32 1, %v100_v9  ;;  %v4305_v17 = vsub.s32 2, %v100_v9 }
  0x53   :  { %351 = vmatprep.mubr.f32.mxu1 %v5124_v1  ;;  %2924 = vmatprep.subr.bf16.mxu0 %v4159_v10  ;;  %v4261_v56 = vpack.c.bf16 %v534_v52, %v530_v51  ;;  %v531_v63 = vld [vmem:[%s5115_s4 + $0x1d0] sm:$0xff]  ;;  %v4283_v4 = vpack.c.bf16 %v533_v59, %v529_v58  ;;  %v4285_v5 = vpack.c.bf16 %v536_v62, %v532_v60  ;;  %v97_v12 = vld [vmem:[%s5113_s2] sm:$0xf]  ;;  %v5123_v62 = vmov 0  }
  0x54   :  { %2926 = vmatpush1.bf16.msra.mxu0 %v4170_v14  ;;  %2956 = vmatprep.subr.bf16.mxu1 %v4172_v15  ;;  %v535_v0 = vld [vmem:[%s5115_s4 + $0x1f0] sm:$0xff]  ;;  %5170 = vst [vmem:[#allocation14_spill] sm:$0xff] %v4303_v16  ;;  %5171 = vst [vmem:[#allocation15_spill] sm:$0xff] %v4305_v17  ;;  %v4314_v24 = vrot.slane %v97_v12, %v4296_v11  ;;  %v4320_v31 = vrot.slane %v97_v12, %v4303_v16 }
  0x55   :  { %2637 = vmatmul.mubr.msk.f32.gmra.mrb[10].mxu0 %vm119_vm0, %v86_v19  ;;  %2958 = vmatpush1.bf16.msra.mxu1 %v4181_v18  ;;  %v4289_v7 = vpack.c.bf16 %v535_v0, %v531_v63  ;;  %v4323_v34 = vrot.slane %v97_v12, %v4305_v17 }
  0x56   :  { %2645 = vmatmul.mubr.msk.f32.gmra.mrb[10].mxu1 %vm119_vm0, %v86_v19  ;;  %244 = vmatprep.mubr.f32.mxu0 %v5124_v1  ;;  %v514_v19 = vld [vmem:[%s5115_s4 + $0x148] sm:$0xff] }
  0x57   :  { %357 = vmatprep.mubr.f32.mxu1 %v5124_v1 }
  0x59   :  { %2638 = vmatmul.mubr.msk.f32.gmra.mrb[12].mxu0 %vm119_vm0, %v87_v20 }
  0x5a   :  { %2646 = vmatmul.mubr.msk.f32.gmra.mrb[12].mxu1 %vm119_vm0, %v87_v20  ;;  %250 = vmatprep.mubr.f32.mxu0 %v5124_v1  ;;  %v518_v20 = vld [vmem:[%s5115_s4 + $0x168] sm:$0xff] }
  0x5b   :  { %363 = vmatprep.mubr.f32.mxu1 %v5124_v1  ;;  %v4195_v22 = vpack.c.bf16 %v518_v20, %v514_v19 }
  0x5d   :  { %2639 = vmatmul.mubr.msk.f32.gmra.mrb[14].mxu0 %vm119_vm0, %v88_v21  ;;  %2928 = vmatprep.subr.bf16.mxu0 %v4195_v22 }
  0x5e   :  { %2647 = vmatmul.mubr.msk.f32.gmra.mrb[14].mxu1 %vm119_vm0, %v88_v21  ;;  %601 = vmatprep.mubr.f32.mxu0 %v5124_v1  ;;  %v516_v21 = vld [vmem:[%s5115_s4 + $0x158] sm:$0xff] }
  0x5f   :  { %672 = vmatprep.mubr.f32.mxu1 %v5124_v1  ;;  %v4208_v28 = vpack.c.bf16 %v520_v26, %v516_v21  ;;  %2930 = vmatpush1.bf16.msra.mxu0 %v4206_v27  ;;  %v113_v21 = vsub.s32 3, %v100_v9  ;;  %v402_v26 = vld [vmem:[%s5114_s3] sm:$0xf] }
  0x60   :  { %2932 = vmatprep.subr.bf16.mxu0 %v4233_v40  ;;  %vm403_vm1 = vcmp.gt.f32.partialorder %v402_v26, 0.5 }
  0x61   :  { %2960 = vmatprep.subr.bf16.mxu1 %v4208_v28  ;;  %v4328_v39 = vrot.slane %v97_v12, %v113_v21  ;;  %v412_v63 = vsel %vm403_vm1, 1, %v5123_v62 }
  0x62   :  { %2962 = vmatpush1.bf16.msra.mxu1 %v4220_v35  ;;  %v424_v1 = vrot.slane %v412_v63, %v4305_v17 }
  0x63   :  { %2964 = vmatprep.subr.bf16.mxu1 %v4247_v48  ;;  %2934 = vmatpush1.bf16.msra.mxu0 %v4235_v43 }
  0x64   :  { %2936 = vmatprep.subr.bf16.mxu0 %v4261_v56  ;;  %vm4382_vm4 = vcmp.eq.s32.totalorder %v424_v1, 1 }
  0x66   :  { %2966 = vmatpush1.bf16.msra.mxu1 %v4259_v55 }
  0x67   :  { %2968 = vmatprep.subr.bf16.mxu1 %v4285_v5  ;;  %2938 = vmatpush1.bf16.msra.mxu0 %v4283_v4 }
  0x68   :  { %2972 = vmatprep.subr.bf16.mxu0 %v4015_v25 }
  0x6a   :  { %2970 = vmatpush1.bf16.msra.mxu1 %v4289_v7 }
  0x6b   :  { %3004 = vmatprep.subr.bf16.mxu1 %v4028_v30  ;;  %v4363_v30 = vrot.slane %v412_v63, %v113_v21 }
  0x6d   :  { %vm432_vm5 = vcmp.eq.s32.totalorder %v4363_v30, 1 }
 0x114   :  { %v4301_v13 = vpop.f32.mrb[0].mxu0 }
 0x115   :  { %v4307_v19 = vpop.f32.mrb[1].mxu0  ;;  %v4309_v20 = vpop.f32.mrb[0].mxu1 }
 0x116   :  { %v4311_v23 = vpop.f32.mrb[1].mxu1 }
 0x118   :  { %v216_v32 = vpop.f32.mrb[2].mxu0 }
 0x119   :  { %v4326_v36 = vadd.f32 %v216_v32, %v4314_v24  ;;  %v218_v38 = vpop.f32.mrb[3].mxu0  ;;  %v329_v44 = vpop.f32.mrb[2].mxu1  ;;  %v416_v32 = vrot.slane %v412_v63, %v4296_v11 }
 0x11a   :  { %v4331_v46 = vadd.f32 %v218_v38, %v4320_v31  ;;  %v4334_v47 = vadd.f32 %v329_v44, %v4323_v34  ;;  %v331_v50 = vpop.f32.mrb[3].mxu1 }
 0x11b   :  { %5172 = vst [vmem:[#allocation16_spill] sm:$0xff] %v4326_v36  ;;  %v4337_v51 = vadd.f32 %v331_v50, %v4328_v39  ;;  %vm4365_vm2 = vcmp.eq.s32.totalorder %v416_v32, 1 }
 0x11c   :  { %5173 = vst [vmem:[#allocation17_spill] sm:$0xff] %v4331_v46  ;;  %5174 = vst [vmem:[#allocation18_spill] sm:$0xff] %v4334_v47  ;;  %v222_v52 = vpop.f32.mrb[4].mxu0 }
 0x11d   :  { %v4340_v58 = vadd.f32 %v222_v52, %v4314_v24  ;;  %v224_v59 = vpop.f32.mrb[5].mxu0  ;;  %v335_v60 = vpop.f32.mrb[4].mxu1  ;;  %v420_v52 = vrot.slane %v412_v63, %v4303_v16 }
 0x11e   :  { %v4344_v0 = vadd.f32 %v224_v59, %v4320_v31  ;;  %v4347_v8 = vadd.f32 %v335_v60, %v4323_v34  ;;  %v337_v9 = vpop.f32.mrb[5].mxu1 }
 0x11f   :  { %v338_v12 = vadd.f32 %v337_v9, %v4328_v39  ;;  %vm4372_vm3 = vcmp.eq.s32.totalorder %v420_v52, 1 }
 0x120   :  { %5175 = vst [vmem:[#allocation19_spill] sm:$0xff] %v4344_v0  ;;  %5176 = vst [vmem:[#allocation20_spill] sm:$0xff] %v4347_v8  ;;  %v228_v26 = vpop.f32.mrb[6].mxu0  ;;  %v326_v0 = vadd.f32 %v4311_v23, %v4328_v39 }
 0x121   :  { %v4352_v38 = vadd.f32 %v228_v26, %v4314_v24  ;;  %v230_v44 = vpop.f32.mrb[7].mxu0  ;;  %v341_v50 = vpop.f32.mrb[6].mxu1 }
 0x122   :  { %v4356_v62 = vadd.f32 %v230_v44, %v4320_v31  ;;  %v4359_v59 = vadd.f32 %v341_v50, %v4323_v34  ;;  %v343_v60 = vpop.f32.mrb[7].mxu1 }
 0x123   :  { %5177 = vst [vmem:[#allocation21_spill] sm:$0xff] %v4352_v38  ;;  %v344_v9 = vadd.f32 %v343_v60, %v4328_v39 }
 0x124   :  { %5178 = vst [vmem:[#allocation22_spill] sm:$0xff] %v4356_v62  ;;  %5179 = vst [vmem:[#allocation23_spill] sm:$0xff] %v4359_v59  ;;  %v234_v11 = vpop.f32.mrb[8].mxu0  ;;  %v4498_v59 = vadd.f32 %v4301_v13, %v4314_v24  ;;  %v4519_v13 = vadd.f32 %v4309_v20, %v4323_v34 }
 0x125   :  { %v4370_v16 = vadd.f32 %v234_v11, %v4314_v24  ;;  %v236_v44 = vpop.f32.mrb[9].mxu0  ;;  %v347_v25 = vpop.f32.mrb[8].mxu1 }
 0x126   :  { %v4377_v17 = vadd.f32 %v236_v44, %v4320_v31  ;;  %v4380_v21 = vadd.f32 %v347_v25, %v4323_v34  ;;  %v349_v63 = vpop.f32.mrb[9].mxu1  ;;  %5198 = vst [vmem:[#allocation36_spill] sm:$0xff] %v4498_v59  ;;  %5202 = vst [vmem:[#allocation40_spill] sm:$0xff] %v4519_v13 }
 0x127   :  { %5182 = vst [vmem:[#allocation24_spill] sm:$0xff] %v4370_v16  ;;  %v350_v11 = vadd.f32 %v349_v63, %v4328_v39 }
 0x128   :  { %5185 = vst [vmem:[#allocation25_spill] sm:$0xff] %v4377_v17  ;;  %5186 = vst [vmem:[#allocation26_spill] sm:$0xff] %v4380_v21  ;;  %v240_v60 = vpop.f32.mrb[10].mxu0 }
 0x129   :  { %v4413_v52 = vadd.f32 %v240_v60, %v4314_v24  ;;  %v242_v16 = vpop.f32.mrb[11].mxu0  ;;  %v353_v1 = vpop.f32.mrb[10].mxu1  ;;  %v4417_v38 = vsel %vm432_vm5, %v344_v9, %v350_v11  ;;  %v4421_v44 = vsel %vm432_vm5, %v350_v11, %v344_v9 }
 0x12a   :  { %5189 = vst [vmem:[#allocation27_spill] sm:$0xff] %v4417_v38  ;;  %5190 = vst [vmem:[#allocation28_spill] sm:$0xff] %v4421_v44  ;;  %v4424_v63 = vadd.f32 %v242_v16, %v4320_v31  ;;  %v4427_v21 = vadd.f32 %v353_v1, %v4323_v34  ;;  %v355_v25 = vpop.f32.mrb[11].mxu1 }
 0x12b   :  { %v356_v60 = vadd.f32 %v355_v25, %v4328_v39 }
 0x12c   :  { %5191 = vst [vmem:[#allocation29_spill] sm:$0xff] %v4424_v63  ;;  %5192 = vst [vmem:[#allocation30_spill] sm:$0xff] %v4427_v21  ;;  %v246_v11 = vpop.f32.mrb[12].mxu0 }
 0x12d   :  { %v4455_v17 = vadd.f32 %v246_v11, %v4314_v24  ;;  %v359_v44 = vpop.f32.mrb[12].mxu1  ;;  %v248_v16 = vpop.f32.mrb[13].mxu0  ;;  %v4459_v38 = vsel %vm432_vm5, %v338_v12, %v356_v60  ;;  %v4463_v25 = vsel %vm432_vm5, %v356_v60, %v338_v12  ;;  %v4515_v12 = vadd.f32 %v4307_v19, %v4320_v31 }
 0x12e   :  { %5194 = vst [vmem:[#allocation32_spill] sm:$0xff] %v4459_v38  ;;  %5195 = vst [vmem:[#allocation33_spill] sm:$0xff] %v4463_v25  ;;  %v4466_v1 = vadd.f32 %v359_v44, %v4323_v34  ;;  %v4469_v62 = vadd.f32 %v248_v16, %v4320_v31  ;;  %v361_v9 = vpop.f32.mrb[13].mxu1 }
 0x12f   :  { %5193 = vst [vmem:[#allocation31_spill] sm:$0xff] %v4455_v17  ;;  %v362_v11 = vadd.f32 %v361_v9, %v4328_v39  ;;  %5201 = vst [vmem:[#allocation39_spill] sm:$0xff] %v4515_v12 }
 0x130   :  { %5196 = vst [vmem:[#allocation34_spill] sm:$0xff] %v4466_v1  ;;  %5197 = vst [vmem:[#allocation35_spill] sm:$0xff] %v4469_v62  ;;  %v252_v60 = vpop.f32.mrb[14].mxu0 }
 0x131   :  { %v4501_v44 = vadd.f32 %v252_v60, %v4314_v24  ;;  %v365_v25 = vpop.f32.mrb[14].mxu1  ;;  %v254_v38 = vpop.f32.mrb[15].mxu0  ;;  %v4506_v9 = vsel %vm432_vm5, %v4337_v51, %v362_v11  ;;  %v4511_v16 = vsel %vm432_vm5, %v362_v11, %v4337_v51 }
 0x132   :  { %5200 = vst [vmem:[#allocation38_spill] sm:$0xff] %v4511_v16  ;;  %v4522_v24 = vadd.f32 %v365_v25, %v4323_v34  ;;  %v4525_v60 = vadd.f32 %v254_v38, %v4320_v31  ;;  %v367_v63 = vpop.f32.mrb[15].mxu1 }
 0x133   :  { %5199 = vst [vmem:[#allocation37_spill] sm:$0xff] %v4501_v44  ;;  %v433_v19 = vsel %vm4365_vm2, %v4498_v59, %v4501_v44  ;;  %v368_v51 = vadd.f32 %v367_v63, %v4328_v39 }
 0x134   :  { %5203 = vst [vmem:[#allocation41_spill] sm:$0xff] %v4522_v24  ;;  %5204 = vst [vmem:[#allocation42_spill] sm:$0xff] %v4525_v60  ;;  %v2648_v34 = vmul.f32 -1.442695, %v433_v19  ;;  %v435_v31 = vsel %vm4382_vm4, %v4519_v13, %v4522_v24  ;;  %v434_v23 = vsel %vm4372_vm3, %v4515_v12, %v4525_v60 }
 0x135   :  { %v2649_v38 = vmul.f32 -1.442695, %v434_v23  ;;  %v436_v63 = vsel %vm432_vm5, %v326_v0, %v368_v51  ;;  %v4558_v11 = vsel %vm432_vm5, %v368_v51, %v326_v0 }
 0x136   :  { %3634 = vpow2.f32 %v2648_v34  ;;  %5205 = vst [vmem:[#allocation43_spill] sm:$0xff] %v4558_v11  ;;  %v2650_v19 = vmul.f32 -1.442695, %v436_v63 }
 0x137   :  { %3636 = vpow2.f32 %v2649_v38 }
 0x138   :  { %3638 = vpow2.f32 %v2650_v19  ;;  %v5212_v19 = vsel %vm4372_vm3, %v4331_v46, %v4469_v62 }
 0x139   :  { %3640 = vtanh.f32 %v435_v31 }
 0x140   :  { %v3635_v20 = vpop.eup %3634 }
 0x141   :  { %v3637_v59 = vpop.eup %3636  ;;  %v440_v44 = vadd.f32 1.0, %v3635_v20 }
 0x142   :  { %v446_v23 = vadd.f32 1.0, %v3637_v59  ;;  %v3639_v39 = vpop.eup %3638  ;;  %v5207_v59 = vmov 0.0  }
 0x143   :  { %3642 = vrcp.f32 %v440_v44  ;;  %v3641_v13 = vpop.eup %3640  ;;  %v453_v34 = vadd.f32 1.0, %v3639_v39  ;;  %v5209_v44 = vld [vmem:[#allocation12_spill] sm:$0xff]  ;;  %v5211_v39 = vsel %vm4382_vm4, %v4334_v47, %v4466_v1 }
 0x144   :  { %3644 = vrcp.f32 %v446_v23 }
 0x145   :  { %3646 = vrcp.f32 %v453_v34 }
 0x14d   :  { %v3643_v24 = vpop.eup %3642 }
 0x14e   :  { %v3645_v16 = vpop.eup %3644  ;;  %v457_v25 = vmul.f32 %v3643_v24, %v3641_v13  ;;  %v5210_v24 = vsel %vm4365_vm2, %v4326_v36, %v4455_v17 }
 0x14f   :  { %v456_v12 = vmul.f32 0.0, %v3645_v16  ;;  %v3647_v0 = vpop.eup %3646 }
 0x151   :  { %v4560_v30 = vadd.f32 %v457_v25, %v456_v12  ;;  %v5208_v12 = vld [vmem:[#allocation11_spill] sm:$0xff] }
 0x153   :  { %3648 = vtanh.f32 %v4560_v30 }
 0x15d   :  { %v3649_v51 = vpop.eup %3648 }
 0x15e   :  { %v4563_v20 = vmul.f32 %v3649_v51, %v3647_v0 }
 0x160   :  { %5206 = vst [vmem:[#allocation44_spill] sm:$0xff] %v4563_v20  ;;  %602 = vmatmul.mubr.f32.vlgmr.msra.gmra.mrb[16].mxu0 %v4563_v20  ;;  %673 = vmatmul.mubr.f32.vlgmr.msra.gmra.mrb[16].mxu1 %v4563_v20 }
 0x161   :  { %2974 = vmatpush1.bf16.msra.mxu0 %v4026_v29  ;;  %3006 = vmatpush1.bf16.msra.mxu1 %v4037_v33 }
 0x162   :  { %2976 = vmatprep.subr.bf16.mxu0 %v4051_v37  ;;  %3008 = vmatprep.subr.bf16.mxu1 %v4064_v42 }
 0x163   :  { %783 = vmatprep.mubr.f32.mxu0 %v5207_v59  ;;  %854 = vmatprep.mubr.f32.mxu1 %v5207_v59 }
 0x165   :  { %2978 = vmatpush1.bf16.msra.mxu0 %v4062_v41  ;;  %3010 = vmatpush1.bf16.msra.mxu1 %v4073_v45 }
 0x166   :  { %2980 = vmatprep.subr.bf16.mxu0 %v4087_v49  ;;  %3012 = vmatprep.subr.bf16.mxu1 %v4100_v54 }
 0x169   :  { %2982 = vmatpush1.bf16.msra.mxu0 %v4098_v53  ;;  %3014 = vmatpush1.bf16.msra.mxu1 %v4109_v57 }
 0x16a   :  { %2984 = vmatprep.subr.bf16.mxu0 %v4123_v61  ;;  %3016 = vmatprep.subr.bf16.mxu1 %v4136_v3 }
 0x16d   :  { %2986 = vmatpush1.bf16.msra.mxu0 %v4134_v2  ;;  %3018 = vmatpush1.bf16.msra.mxu1 %v4145_v6 }
 0x16e   :  { %2988 = vmatprep.subr.bf16.mxu0 %v4159_v10  ;;  %3020 = vmatprep.subr.bf16.mxu1 %v4172_v15 }
 0x171   :  { %2990 = vmatpush1.bf16.msra.mxu0 %v4170_v14  ;;  %3022 = vmatpush1.bf16.msra.mxu1 %v4181_v18 }
 0x172   :  { %2992 = vmatprep.subr.bf16.mxu0 %v4195_v22  ;;  %3024 = vmatprep.subr.bf16.mxu1 %v4208_v28 }
 0x175   :  { %2994 = vmatpush1.bf16.msra.mxu0 %v4206_v27  ;;  %3026 = vmatpush1.bf16.msra.mxu1 %v4220_v35 }
 0x176   :  { %2996 = vmatprep.subr.bf16.mxu0 %v4233_v40  ;;  %3028 = vmatprep.subr.bf16.mxu1 %v4247_v48 }
 0x179   :  { %2998 = vmatpush1.bf16.msra.mxu0 %v4235_v43  ;;  %3030 = vmatpush1.bf16.msra.mxu1 %v4259_v55 }
 0x17a   :  { %3000 = vmatprep.subr.bf16.mxu0 %v4261_v56  ;;  %3032 = vmatprep.subr.bf16.mxu1 %v4285_v5 }
 0x17d   :  { %3002 = vmatpush1.bf16.msra.mxu0 %v4283_v4  ;;  %3034 = vmatpush1.bf16.msra.mxu1 %v4289_v7 }
 0x17e   :  { %3036 = vmatprep.subr.bf16.mxu0 %v5208_v12  ;;  %3068 = vmatprep.subr.bf16.mxu1 %v5209_v44 }
 0x233   :  { %v603_v16 = vpop.f32.mrb[16].mxu0  ;;  %v674_v13 = vpop.f32.mrb[16].mxu1 }
 0x234   :  { %v679_v31 = vadd.f32 %v603_v16, %v5210_v24  ;;  %v681_v38 = vadd.f32 %v674_v13, %v5211_v39  ;;  %v605_v63 = vpop.f32.mrb[17].mxu0  ;;  %v676_v25 = vpop.f32.mrb[17].mxu1 }
 0x235   :  { %v680_v23 = vadd.f32 %v605_v63, %v5212_v19  ;;  %v682_v34 = vadd.f32 %v676_v25, %v4506_v9 }
 0x236   :  { %v2651_v0 = vmul.f32 -1.442695, %v679_v31 }
 0x237   :  { %v2652_v51 = vmul.f32 -1.442695, %v680_v23  ;;  %v2653_v16 = vmul.f32 -1.442695, %v682_v34 }
 0x238   :  { %3650 = vpow2.f32 %v2651_v0 }
 0x239   :  { %3652 = vpow2.f32 %v2652_v51  ;;  %v5215_v51 = vld [vmem:[#allocation19_spill] sm:$0xff] }
 0x23a   :  { %3654 = vpow2.f32 %v2653_v16  ;;  %v5216_v16 = vld [vmem:[#allocation29_spill] sm:$0xff] }
 0x23b   :  { %3656 = vtanh.f32 %v681_v38 }
 0x242   :  { %v3651_v24 = vpop.eup %3650 }
 0x243   :  { %v3653_v20 = vpop.eup %3652  ;;  %v686_v11 = vadd.f32 1.0, %v3651_v24  ;;  %v5217_v24 = vsel %vm4372_vm3, %v5215_v51, %v5216_v16 }
 0x244   :  { %v692_v13 = vadd.f32 1.0, %v3653_v20  ;;  %v3655_v39 = vpop.eup %3654 }
 0x245   :  { %3658 = vrcp.f32 %v686_v11  ;;  %v3657_v60 = vpop.eup %3656  ;;  %v699_v19 = vadd.f32 1.0, %v3655_v39  ;;  %v5218_v39 = vld [vmem:[#allocation32_spill] sm:$0xff] }
 0x246   :  { %3660 = vrcp.f32 %v692_v13 }
 0x247   :  { %3662 = vrcp.f32 %v699_v19 }
 0x24f   :  { %v3659_v47 = vpop.eup %3658 }
 0x250   :  { %v3661_v46 = vpop.eup %3660  ;;  %v703_v63 = vmul.f32 %v3659_v47, %v3657_v60  ;;  %v5213_v60 = vsel %vm4365_vm2, %v4340_v58, %v4413_v52 }
 0x251   :  { %v702_v9 = vmul.f32 %v3661_v46, %v4560_v30  ;;  %v3663_v25 = vpop.eup %3662  ;;  %v5214_v30 = vsel %vm4382_vm4, %v4347_v8, %v4427_v21 }
 0x253   :  { %v4618_v31 = vadd.f32 %v703_v63, %v702_v9 }
 0x255   :  { %3664 = vtanh.f32 %v4618_v31 }
 0x25f   :  { %v3665_v23 = vpop.eup %3664 }
 0x260   :  { %v706_v34 = vmul.f32 %v3665_v23, %v3663_v25 }
 0x262   :  { %784 = vmatmul.mubr.f32.vlgmr.msra.gmra.mrb[18].mxu0 %v706_v34  ;;  %855 = vmatmul.mubr.f32.vlgmr.msra.gmra.mrb[18].mxu1 %v706_v34 }
 0x263   :  { %3038 = vmatpush1.bf16.msra.mxu0 %v4026_v29  ;;  %3070 = vmatpush1.bf16.msra.mxu1 %v4037_v33 }
 0x264   :  { %3040 = vmatprep.subr.bf16.mxu0 %v4051_v37  ;;  %3072 = vmatprep.subr.bf16.mxu1 %v4064_v42 }
 0x265   :  { %965 = vmatprep.mubr.f32.mxu0 %v5207_v59  ;;  %1036 = vmatprep.mubr.f32.mxu1 %v5207_v59 }
 0x267   :  { %3042 = vmatpush1.bf16.msra.mxu0 %v4062_v41  ;;  %3074 = vmatpush1.bf16.msra.mxu1 %v4073_v45 }
 0x268   :  { %3044 = vmatprep.subr.bf16.mxu0 %v4087_v49  ;;  %3076 = vmatprep.subr.bf16.mxu1 %v4100_v54 }
 0x26b   :  { %3046 = vmatpush1.bf16.msra.mxu0 %v4098_v53  ;;  %3078 = vmatpush1.bf16.msra.mxu1 %v4109_v57 }
 0x26c   :  { %3048 = vmatprep.subr.bf16.mxu0 %v4123_v61  ;;  %3080 = vmatprep.subr.bf16.mxu1 %v4136_v3 }
 0x26f   :  { %3050 = vmatpush1.bf16.msra.mxu0 %v4134_v2  ;;  %3082 = vmatpush1.bf16.msra.mxu1 %v4145_v6 }
 0x270   :  { %3052 = vmatprep.subr.bf16.mxu0 %v4159_v10  ;;  %3084 = vmatprep.subr.bf16.mxu1 %v4172_v15 }
 0x273   :  { %3054 = vmatpush1.bf16.msra.mxu0 %v4170_v14  ;;  %3086 = vmatpush1.bf16.msra.mxu1 %v4181_v18 }
 0x274   :  { %3056 = vmatprep.subr.bf16.mxu0 %v4195_v22  ;;  %3088 = vmatprep.subr.bf16.mxu1 %v4208_v28 }
 0x277   :  { %3058 = vmatpush1.bf16.msra.mxu0 %v4206_v27  ;;  %3090 = vmatpush1.bf16.msra.mxu1 %v4220_v35 }
 0x278   :  { %3060 = vmatprep.subr.bf16.mxu0 %v4233_v40  ;;  %3092 = vmatprep.subr.bf16.mxu1 %v4247_v48 }
 0x27b   :  { %3062 = vmatpush1.bf16.msra.mxu0 %v4235_v43  ;;  %3094 = vmatpush1.bf16.msra.mxu1 %v4259_v55 }
 0x27c   :  { %3064 = vmatprep.subr.bf16.mxu0 %v4261_v56  ;;  %3096 = vmatprep.subr.bf16.mxu1 %v4285_v5 }
 0x27f   :  { %3066 = vmatpush1.bf16.msra.mxu0 %v4283_v4  ;;  %3098 = vmatpush1.bf16.msra.mxu1 %v4289_v7 }
 0x280   :  { %3100 = vmatprep.subr.bf16.mxu0 %v5208_v12  ;;  %3132 = vmatprep.subr.bf16.mxu1 %v5209_v44 }
 0x335   :  { %v785_v46 = vpop.f32.mrb[18].mxu0  ;;  %v856_v47 = vpop.f32.mrb[18].mxu1 }
 0x336   :  { %v861_v11 = vadd.f32 %v785_v46, %v5213_v60  ;;  %v863_v20 = vadd.f32 %v856_v47, %v5214_v30  ;;  %v787_v38 = vpop.f32.mrb[19].mxu0  ;;  %v858_v0 = vpop.f32.mrb[19].mxu1 }
 0x337   :  { %v862_v13 = vadd.f32 %v787_v38, %v5217_v24  ;;  %v864_v63 = vadd.f32 %v858_v0, %v5218_v39 }
 0x338   :  { %v2654_v19 = vmul.f32 -1.442695, %v861_v11 }
 0x339   :  { %v2655_v9 = vmul.f32 -1.442695, %v862_v13  ;;  %v2656_v25 = vmul.f32 -1.442695, %v864_v63 }
 0x33a   :  { %3666 = vpow2.f32 %v2654_v19 }
 0x33b   :  { %3668 = vpow2.f32 %v2655_v9 }
 0x33c   :  { %3670 = vpow2.f32 %v2656_v25  ;;  %v5222_v25 = vld [vmem:[#allocation23_spill] sm:$0xff] }
 0x33d   :  { %3672 = vtanh.f32 %v863_v20  ;;  %v5220_v20 = vld [vmem:[#allocation24_spill] sm:$0xff] }
 0x344   :  { %v3667_v23 = vpop.eup %3666 }
 0x345   :  { %v3669_v34 = vpop.eup %3668  ;;  %v868_v46 = vadd.f32 1.0, %v3667_v23  ;;  %v5223_v23 = vld [vmem:[#allocation26_spill] sm:$0xff] }
 0x346   :  { %v874_v47 = vadd.f32 1.0, %v3669_v34  ;;  %v3671_v60 = vpop.eup %3670  ;;  %v5224_v34 = vsel %vm4382_vm4, %v5222_v25, %v5223_v23 }
 0x347   :  { %3674 = vrcp.f32 %v868_v46  ;;  %v3673_v30 = vpop.eup %3672  ;;  %v881_v24 = vadd.f32 1.0, %v3671_v60 }
 0x348   :  { %3676 = vrcp.f32 %v874_v47 }
 0x349   :  { %3678 = vrcp.f32 %v881_v24 }
 0x351   :  { %v3675_v62 = vpop.eup %3674 }
 0x352   :  { %v3677_v1 = vpop.eup %3676  ;;  %v885_v38 = vmul.f32 %v3675_v62, %v3673_v30  ;;  %v5225_v30 = vld [vmem:[#allocation22_spill] sm:$0xff] }
 0x353   :  { %v884_v11 = vmul.f32 %v3677_v1, %v4618_v31  ;;  %v3679_v13 = vpop.eup %3678  ;;  %v5219_v31 = vld [vmem:[#allocation21_spill] sm:$0xff] }
 0x354   :  { %v5221_v19 = vsel %vm4365_vm2, %v5219_v31, %v5220_v20 }
 0x355   :  { %v4672_v0 = vadd.f32 %v885_v38, %v884_v11  ;;  %v5226_v38 = vld [vmem:[#allocation25_spill] sm:$0xff] }
 0x356   :  { %v5227_v24 = vsel %vm4372_vm3, %v5225_v30, %v5226_v38 }
 0x357   :  { %3680 = vtanh.f32 %v4672_v0 }
 0x361   :  { %v3681_v39 = vpop.eup %3680 }
 0x362   :  { %v888_v63 = vmul.f32 %v3681_v39, %v3679_v13  ;;  %v5228_v13 = vld [vmem:[#allocation27_spill] sm:$0xff] }
 0x364   :  { %966 = vmatmul.mubr.f32.vlgmr.msra.gmra.mrb[20].mxu0 %v888_v63  ;;  %1037 = vmatmul.mubr.f32.vlgmr.msra.gmra.mrb[20].mxu1 %v888_v63 }
 0x365   :  { %3102 = vmatpush1.bf16.msra.mxu0 %v4026_v29  ;;  %3134 = vmatpush1.bf16.msra.mxu1 %v4037_v33 }
 0x366   :  { %3104 = vmatprep.subr.bf16.mxu0 %v4051_v37  ;;  %3136 = vmatprep.subr.bf16.mxu1 %v4064_v42 }
 0x367   :  { %1139 = vmatprep.mubr.f32.mxu0 %v5207_v59  ;;  %1210 = vmatprep.mubr.f32.mxu1 %v5207_v59 }
 0x369   :  { %3106 = vmatpush1.bf16.msra.mxu0 %v4062_v41  ;;  %3138 = vmatpush1.bf16.msra.mxu1 %v4073_v45 }
 0x36a   :  { %3108 = vmatprep.subr.bf16.mxu0 %v4087_v49  ;;  %3140 = vmatprep.subr.bf16.mxu1 %v4100_v54 }
 0x36d   :  { %3110 = vmatpush1.bf16.msra.mxu0 %v4098_v53  ;;  %3142 = vmatpush1.bf16.msra.mxu1 %v4109_v57 }
 0x36e   :  { %3112 = vmatprep.subr.bf16.mxu0 %v4123_v61  ;;  %3144 = vmatprep.subr.bf16.mxu1 %v4136_v3 }
 0x371   :  { %3114 = vmatpush1.bf16.msra.mxu0 %v4134_v2  ;;  %3146 = vmatpush1.bf16.msra.mxu1 %v4145_v6 }
 0x372   :  { %3116 = vmatprep.subr.bf16.mxu0 %v4159_v10  ;;  %3148 = vmatprep.subr.bf16.mxu1 %v4172_v15 }
 0x375   :  { %3118 = vmatpush1.bf16.msra.mxu0 %v4170_v14  ;;  %3150 = vmatpush1.bf16.msra.mxu1 %v4181_v18 }
 0x376   :  { %3120 = vmatprep.subr.bf16.mxu0 %v4195_v22  ;;  %3152 = vmatprep.subr.bf16.mxu1 %v4208_v28 }
 0x379   :  { %3122 = vmatpush1.bf16.msra.mxu0 %v4206_v27  ;;  %3154 = vmatpush1.bf16.msra.mxu1 %v4220_v35 }
 0x37a   :  { %3124 = vmatprep.subr.bf16.mxu0 %v4233_v40  ;;  %3156 = vmatprep.subr.bf16.mxu1 %v4247_v48 }
 0x37d   :  { %3126 = vmatpush1.bf16.msra.mxu0 %v4235_v43  ;;  %3158 = vmatpush1.bf16.msra.mxu1 %v4259_v55 }
 0x37e   :  { %3128 = vmatprep.subr.bf16.mxu0 %v4261_v56  ;;  %3160 = vmatprep.subr.bf16.mxu1 %v4285_v5 }
 0x381   :  { %3130 = vmatpush1.bf16.msra.mxu0 %v4283_v4  ;;  %3162 = vmatpush1.bf16.msra.mxu1 %v4289_v7 }
 0x382   :  { %3164 = vmatprep.subr.bf16.mxu0 %v5208_v12  ;;  %3196 = vmatprep.subr.bf16.mxu1 %v5209_v44 }
 0x437   :  { %v967_v62 = vpop.f32.mrb[20].mxu0  ;;  %v1038_v1 = vpop.f32.mrb[20].mxu1 }
 0x438   :  { %v1043_v9 = vadd.f32 %v967_v62, %v5221_v19  ;;  %v1045_v46 = vadd.f32 %v1038_v1, %v5224_v34  ;;  %v969_v47 = vpop.f32.mrb[21].mxu0  ;;  %v1040_v60 = vpop.f32.mrb[21].mxu1 }
 0x439   :  { %v1044_v11 = vadd.f32 %v969_v47, %v5227_v24  ;;  %v1046_v39 = vadd.f32 %v1040_v60, %v5228_v13 }
 0x43a   :  { %v2657_v63 = vmul.f32 -1.442695, %v1043_v9 }
 0x43b   :  { %v2658_v36 = vmul.f32 -1.442695, %v1044_v11  ;;  %v2659_v62 = vmul.f32 -1.442695, %v1046_v39 }
 0x43c   :  { %3682 = vpow2.f32 %v2657_v63  ;;  %v5231_v63 = vsel %vm4372_vm3, %v5226_v38, %v5225_v30 }
 0x43d   :  { %3684 = vpow2.f32 %v2658_v36 }
 0x43e   :  { %3686 = vpow2.f32 %v2659_v62 }
 0x43f   :  { %3688 = vtanh.f32 %v1045_v46 }
 0x446   :  { %v3683_v19 = vpop.eup %3682 }
 0x447   :  { %v3685_v17 = vpop.eup %3684  ;;  %v1050_v51 = vadd.f32 1.0, %v3683_v19  ;;  %v5232_v19 = vld [vmem:[#allocation28_spill] sm:$0xff] }
 0x448   :  { %v1056_v1 = vadd.f32 1.0, %v3685_v17  ;;  %v3687_v34 = vpop.eup %3686 }
 0x449   :  { %3690 = vrcp.f32 %v1050_v51  ;;  %v3689_v16 = vpop.eup %3688  ;;  %v1063_v24 = vadd.f32 1.0, %v3687_v34 }
 0x44a   :  { %3692 = vrcp.f32 %v1056_v1 }
 0x44b   :  { %3694 = vrcp.f32 %v1063_v24 }
 0x453   :  { %v3691_v8 = vpop.eup %3690 }
 0x454   :  { %v3693_v21 = vpop.eup %3692  ;;  %v1067_v47 = vmul.f32 %v3691_v8, %v3689_v16  ;;  %v5230_v16 = vsel %vm4382_vm4, %v5223_v23, %v5222_v25 }
 0x455   :  { %v1066_v9 = vmul.f32 %v3693_v21, %v4672_v0  ;;  %v3695_v36 = vpop.eup %3694  ;;  %v5229_v21 = vsel %vm4365_vm2, %v5220_v20, %v5219_v31 }
 0x457   :  { %v4726_v60 = vadd.f32 %v1067_v47, %v1066_v9 }
 0x459   :  { %3696 = vtanh.f32 %v4726_v60 }
 0x463   :  { %v3697_v11 = vpop.eup %3696 }
 0x464   :  { %v1070_v13 = vmul.f32 %v3697_v11, %v3695_v36 }
 0x466   :  { %1140 = vmatmul.mubr.f32.vlgmr.msra.gmra.mrb[22].mxu0 %v1070_v13  ;;  %1211 = vmatmul.mubr.f32.vlgmr.msra.gmra.mrb[22].mxu1 %v1070_v13 }
 0x467   :  { %3166 = vmatpush1.bf16.msra.mxu0 %v4026_v29  ;;  %3198 = vmatpush1.bf16.msra.mxu1 %v4037_v33 }
 0x468   :  { %3168 = vmatprep.subr.bf16.mxu0 %v4051_v37  ;;  %3200 = vmatprep.subr.bf16.mxu1 %v4064_v42 }
 0x469   :  { %1313 = vmatprep.mubr.f32.mxu0 %v5207_v59  ;;  %1384 = vmatprep.mubr.f32.mxu1 %v5207_v59 }
 0x46b   :  { %3170 = vmatpush1.bf16.msra.mxu0 %v4062_v41  ;;  %3202 = vmatpush1.bf16.msra.mxu1 %v4073_v45 }
 0x46c   :  { %3172 = vmatprep.subr.bf16.mxu0 %v4087_v49  ;;  %3204 = vmatprep.subr.bf16.mxu1 %v4100_v54 }
 0x46f   :  { %3174 = vmatpush1.bf16.msra.mxu0 %v4098_v53  ;;  %3206 = vmatpush1.bf16.msra.mxu1 %v4109_v57 }
 0x470   :  { %3176 = vmatprep.subr.bf16.mxu0 %v4123_v61  ;;  %3208 = vmatprep.subr.bf16.mxu1 %v4136_v3 }
 0x473   :  { %3178 = vmatpush1.bf16.msra.mxu0 %v4134_v2  ;;  %3210 = vmatpush1.bf16.msra.mxu1 %v4145_v6 }
 0x474   :  { %3180 = vmatprep.subr.bf16.mxu0 %v4159_v10  ;;  %3212 = vmatprep.subr.bf16.mxu1 %v4172_v15 }
 0x477   :  { %3182 = vmatpush1.bf16.msra.mxu0 %v4170_v14  ;;  %3214 = vmatpush1.bf16.msra.mxu1 %v4181_v18 }
 0x478   :  { %3184 = vmatprep.subr.bf16.mxu0 %v4195_v22  ;;  %3216 = vmatprep.subr.bf16.mxu1 %v4208_v28 }
 0x47b   :  { %3186 = vmatpush1.bf16.msra.mxu0 %v4206_v27  ;;  %3218 = vmatpush1.bf16.msra.mxu1 %v4220_v35 }
 0x47c   :  { %3188 = vmatprep.subr.bf16.mxu0 %v4233_v40  ;;  %3220 = vmatprep.subr.bf16.mxu1 %v4247_v48 }
 0x47f   :  { %3190 = vmatpush1.bf16.msra.mxu0 %v4235_v43  ;;  %3222 = vmatpush1.bf16.msra.mxu1 %v4259_v55 }
 0x480   :  { %3192 = vmatprep.subr.bf16.mxu0 %v4261_v56  ;;  %3224 = vmatprep.subr.bf16.mxu1 %v4285_v5 }
 0x483   :  { %3194 = vmatpush1.bf16.msra.mxu0 %v4283_v4  ;;  %3226 = vmatpush1.bf16.msra.mxu1 %v4289_v7 }
 0x484   :  { %3228 = vmatprep.subr.bf16.mxu0 %v5208_v12  ;;  %3260 = vmatprep.subr.bf16.mxu1 %v5209_v44 }
 0x539   :  { %v1141_v17 = vpop.f32.mrb[22].mxu0  ;;  %v1212_v8 = vpop.f32.mrb[22].mxu1 }
 0x53a   :  { %v1217_v51 = vadd.f32 %v1141_v17, %v5229_v21  ;;  %v1219_v0 = vadd.f32 %v1212_v8, %v5230_v16  ;;  %v1143_v46 = vpop.f32.mrb[23].mxu0  ;;  %v1214_v39 = vpop.f32.mrb[23].mxu1 }
 0x53b   :  { %v1218_v62 = vadd.f32 %v1143_v46, %v5231_v63  ;;  %v1220_v1 = vadd.f32 %v1214_v39, %v5232_v19  ;;  %v5233_v46 = vsel %vm4365_vm2, %v4413_v52, %v4340_v58  ;;  %v5234_v63 = vld [vmem:[#allocation30_spill] sm:$0xff] }
 0x53c   :  { %v2660_v34 = vmul.f32 -1.442695, %v1217_v51 }
 0x53d   :  { %v2661_v47 = vmul.f32 -1.442695, %v1218_v62  ;;  %v2662_v31 = vmul.f32 -1.442695, %v1220_v1  ;;  %v5235_v62 = vld [vmem:[#allocation20_spill] sm:$0xff] }
 0x53e   :  { %3698 = vpow2.f32 %v2660_v34  ;;  %v5236_v19 = vsel %vm4382_vm4, %v5234_v63, %v5235_v62 }
 0x53f   :  { %3700 = vpow2.f32 %v2661_v47 }
 0x540   :  { %3702 = vpow2.f32 %v2662_v31 }
 0x541   :  { %3704 = vtanh.f32 %v1219_v0 }
 0x548   :  { %v3699_v20 = vpop.eup %3698 }
 0x549   :  { %v3701_v24 = vpop.eup %3700  ;;  %v1224_v9 = vadd.f32 1.0, %v3699_v20 }
 0x54a   :  { %v1230_v25 = vadd.f32 1.0, %v3701_v24  ;;  %v3703_v23 = vpop.eup %3702  ;;  %v5240_v24 = vld [vmem:[#allocation33_spill] sm:$0xff] }
 0x54b   :  { %3706 = vrcp.f32 %v1224_v9  ;;  %v3705_v36 = vpop.eup %3704  ;;  %v1237_v13 = vadd.f32 1.0, %v3703_v23 }
 0x54c   :  { %3708 = vrcp.f32 %v1230_v25 }
 0x54d   :  { %3710 = vrcp.f32 %v1237_v13 }
 0x555   :  { %v3707_v11 = vpop.eup %3706 }
 0x556   :  { %v3709_v30 = vpop.eup %3708  ;;  %v1241_v38 = vmul.f32 %v3707_v11, %v3705_v36 }
 0x557   :  { %v1240_v17 = vmul.f32 %v3709_v30, %v4726_v60  ;;  %v3711_v21 = vpop.eup %3710 }
 0x559   :  { %v4780_v8 = vadd.f32 %v1241_v38, %v1240_v17 }
 0x55b   :  { %3712 = vtanh.f32 %v4780_v8 }
 0x565   :  { %v3713_v51 = vpop.eup %3712 }
 0x566   :  { %v1244_v16 = vmul.f32 %v3713_v51, %v3711_v21 }
 0x568   :  { %1314 = vmatmul.mubr.f32.vlgmr.msra.gmra.mrb[24].mxu0 %v1244_v16  ;;  %1385 = vmatmul.mubr.f32.vlgmr.msra.gmra.mrb[24].mxu1 %v1244_v16 }
 0x569   :  { %3230 = vmatpush1.bf16.msra.mxu0 %v4026_v29  ;;  %3262 = vmatpush1.bf16.msra.mxu1 %v4037_v33 }
 0x56a   :  { %3232 = vmatprep.subr.bf16.mxu0 %v4051_v37  ;;  %3264 = vmatprep.subr.bf16.mxu1 %v4064_v42 }
 0x56b   :  { %1487 = vmatprep.mubr.f32.mxu0 %v5207_v59  ;;  %1558 = vmatprep.mubr.f32.mxu1 %v5207_v59 }
 0x56d   :  { %3234 = vmatpush1.bf16.msra.mxu0 %v4062_v41  ;;  %3266 = vmatpush1.bf16.msra.mxu1 %v4073_v45 }
 0x56e   :  { %3236 = vmatprep.subr.bf16.mxu0 %v4087_v49  ;;  %3268 = vmatprep.subr.bf16.mxu1 %v4100_v54 }
 0x571   :  { %3238 = vmatpush1.bf16.msra.mxu0 %v4098_v53  ;;  %3270 = vmatpush1.bf16.msra.mxu1 %v4109_v57 }
 0x572   :  { %3240 = vmatprep.subr.bf16.mxu0 %v4123_v61  ;;  %3272 = vmatprep.subr.bf16.mxu1 %v4136_v3 }
 0x575   :  { %3242 = vmatpush1.bf16.msra.mxu0 %v4134_v2  ;;  %3274 = vmatpush1.bf16.msra.mxu1 %v4145_v6 }
 0x576   :  { %3244 = vmatprep.subr.bf16.mxu0 %v4159_v10  ;;  %3276 = vmatprep.subr.bf16.mxu1 %v4172_v15 }
 0x579   :  { %3246 = vmatpush1.bf16.msra.mxu0 %v4170_v14  ;;  %3278 = vmatpush1.bf16.msra.mxu1 %v4181_v18 }
 0x57a   :  { %3248 = vmatprep.subr.bf16.mxu0 %v4195_v22  ;;  %3280 = vmatprep.subr.bf16.mxu1 %v4208_v28 }
 0x57d   :  { %3250 = vmatpush1.bf16.msra.mxu0 %v4206_v27  ;;  %3282 = vmatpush1.bf16.msra.mxu1 %v4220_v35 }
 0x57e   :  { %3252 = vmatprep.subr.bf16.mxu0 %v4233_v40  ;;  %3284 = vmatprep.subr.bf16.mxu1 %v4247_v48 }
 0x581   :  { %3254 = vmatpush1.bf16.msra.mxu0 %v4235_v43  ;;  %3286 = vmatpush1.bf16.msra.mxu1 %v4259_v55 }
 0x582   :  { %3256 = vmatprep.subr.bf16.mxu0 %v4261_v56  ;;  %3288 = vmatprep.subr.bf16.mxu1 %v4285_v5 }
 0x585   :  { %3258 = vmatpush1.bf16.msra.mxu0 %v4283_v4  ;;  %3290 = vmatpush1.bf16.msra.mxu1 %v4289_v7 }
 0x586   :  { %3292 = vmatprep.subr.bf16.mxu0 %v5208_v12  ;;  %3324 = vmatprep.subr.bf16.mxu1 %v5209_v44  ;;  %v5237_v12 = vld [vmem:[#allocation29_spill] sm:$0xff]  ;;  %v5238_v44 = vld [vmem:[#allocation19_spill] sm:$0xff] }
 0x587   :  { %v5239_v31 = vsel %vm4372_vm3, %v5237_v12, %v5238_v44  ;;  %v1778_v12 = vld [vmem:[#allocation6 + $0x8] sm:$0xff]  ;;  %v1781_v44 = vld [vmem:[#allocation6 + $0x20] sm:$0xff] }
 0x63b   :  { %v1315_v60 = vpop.f32.mrb[24].mxu0  ;;  %v1386_v0 = vpop.f32.mrb[24].mxu1 }
 0x63c   :  { %v1391_v39 = vadd.f32 %v1315_v60, %v5233_v46  ;;  %v1393_v1 = vadd.f32 %v1386_v0, %v5236_v19  ;;  %v1317_v34 = vpop.f32.mrb[25].mxu0  ;;  %v1388_v47 = vpop.f32.mrb[25].mxu1 }
 0x63d   :  { %v1392_v20 = vadd.f32 %v1317_v34, %v5239_v31  ;;  %v1394_v9 = vadd.f32 %v1388_v47, %v5240_v24  ;;  %v3355_v31 = vpack.c.bf16 %v1781_v44, %v1778_v12  ;;  %v1780_v24 = vld [vmem:[#allocation6 + $0x18] sm:$0xff]  ;;  %v1815_v44 = vld [vmem:[#allocation6 + $0x130] sm:$0xff] }
 0x63e   :  { %v2663_v25 = vmul.f32 -1.442695, %v1391_v39  ;;  %v1816_v12 = vld [vmem:[#allocation6 + $0x138] sm:$0xff] }
 0x63f   :  { %v2664_v23 = vmul.f32 -1.442695, %v1392_v20  ;;  %v2665_v58 = vmul.f32 -1.442695, %v1394_v9  ;;  %v1777_v20 = vld [vmem:[#allocation6] sm:$0xff]  ;;  %v1779_v9 = vld [vmem:[#allocation6 + $0x10] sm:$0xff] }
 0x640   :  { %3714 = vpow2.f32 %v2663_v25  ;;  %v3357_v25 = vpack.c.bf16 %v1780_v24, %v1777_v20  ;;  %v1820_v20 = vld [vmem:[#allocation6 + $0x158] sm:$0xff]  ;;  %v1823_v24 = vld [vmem:[#allocation6 + $0x170] sm:$0xff] }
 0x641   :  { %3716 = vpow2.f32 %v2664_v23  ;;  %v1782_v23 = vld [vmem:[#allocation6 + $0x28] sm:$0xff] }
 0x642   :  { %3718 = vpow2.f32 %v2665_v58  ;;  %v3841_v58 = vmov 0.0|0.0  }
 0x643   :  { %3720 = vtanh.f32 %v1393_v1 }
 0x64a   :  { %v3715_v52 = vpop.eup %3714 }
 0x64b   :  { %v3717_v36 = vpop.eup %3716  ;;  %v1398_v11 = vadd.f32 1.0, %v3715_v52  ;;  %v3388_v52 = vpack.c.bf16 %v1782_v23, %v1779_v9  ;;  %v3383_v23 = vpack.c.bf16 %v1823_v24, %v1820_v20  ;;  %v1996_v24 = vld [vmem:[#allocation8 + $0x50] sm:$0xff] }
 0x64c   :  { %v1404_v30 = vadd.f32 1.0, %v3717_v36  ;;  %v3719_v38 = vpop.eup %3718  ;;  %v1784_v36 = vld [vmem:[#allocation6 + $0x38] sm:$0xff] }
 0x64d   :  { %3722 = vrcp.f32 %v1398_v11  ;;  %v3721_v13 = vpop.eup %3720  ;;  %v1411_v16 = vadd.f32 1.0, %v3719_v38  ;;  %v1787_v11 = vld [vmem:[#allocation6 + $0x50] sm:$0xff] }
 0x64e   :  { %3724 = vrcp.f32 %v1404_v30  ;;  %v3359_v30 = vpack.c.bf16 %v1787_v11, %v1784_v36  ;;  %v1783_v38 = vld [vmem:[#allocation6 + $0x30] sm:$0xff]  ;;  %v1822_v36 = vld [vmem:[#allocation6 + $0x168] sm:$0xff]  ;;  %v1821_v11 = vld [vmem:[#allocation6 + $0x160] sm:$0xff] }
 0x64f   :  { %3726 = vrcp.f32 %v1411_v16 }
 0x657   :  { %v3723_v17 = vpop.eup %3722 }
 0x658   :  { %v3725_v21 = vpop.eup %3724  ;;  %v1415_v51 = vmul.f32 %v3723_v17, %v3721_v13  ;;  %v1786_v13 = vld [vmem:[#allocation6 + $0x48] sm:$0xff]  ;;  %v1785_v17 = vld [vmem:[#allocation6 + $0x40] sm:$0xff] }
 0x659   :  { %v1414_v60 = vmul.f32 %v3725_v21, %v4780_v8  ;;  %v3727_v46 = vpop.eup %3726  ;;  %v3361_v21 = vpack.c.bf16 %v1786_v13, %v1783_v38 }
 0x65b   :  { %v4834_v0 = vadd.f32 %v1415_v51, %v1414_v60  ;;  %v1788_v51 = vld [vmem:[#allocation6 + $0x58] sm:$0xff]  ;;  %v1790_v60 = vld [vmem:[#allocation6 + $0x68] sm:$0xff] }
 0x65c   :  { %v3391_v16 = vpack.c.bf16 %v1788_v51, %v1785_v17  ;;  %v1987_v17 = vld [vmem:[#allocation8 + $0x8] sm:$0xff] }
 0x65d   :  { %3728 = vtanh.f32 %v4834_v0 }
 0x667   :  { %v3729_v39 = vpop.eup %3728 }
 0x668   :  { %v1418_v63 = vmul.f32 %v3729_v39, %v3727_v46  ;;  %v1789_v39 = vld [vmem:[#allocation6 + $0x60] sm:$0xff] }
 0x66a   :  { %1488 = vmatmul.mubr.f32.vlgmr.msra.gmra.mrb[26].mxu0 %v1418_v63  ;;  %1559 = vmatmul.mubr.f32.vlgmr.msra.gmra.mrb[26].mxu1 %v1418_v63  ;;  %v1792_v63 = vld [vmem:[#allocation6 + $0x78] sm:$0xff] }
 0x66b   :  { %3294 = vmatpush1.bf16.msra.mxu0 %v4026_v29  ;;  %3326 = vmatpush1.bf16.msra.mxu1 %v4037_v33 }
 0x66c   :  { %3296 = vmatprep.subr.bf16.mxu0 %v4051_v37  ;;  %3328 = vmatprep.subr.bf16.mxu1 %v4064_v42  ;;  %v5241_v37 = vld [vmem:[#allocation31_spill] sm:$0xff] }
 0x66d   :  { %1661 = vmatprep.mubr.f32.mxu0 %v5207_v59  ;;  %1732 = vmatprep.mubr.f32.mxu1 %v5207_v59 }
 0x66f   :  { %3298 = vmatpush1.bf16.msra.mxu0 %v4062_v41  ;;  %3330 = vmatpush1.bf16.msra.mxu1 %v4073_v45  ;;  %v5242_v41 = vld [vmem:[#allocation16_spill] sm:$0xff] }
 0x670   :  { %3300 = vmatprep.subr.bf16.mxu0 %v4087_v49  ;;  %3332 = vmatprep.subr.bf16.mxu1 %v4100_v54  ;;  %v5243_v42 = vsel %vm4365_vm2, %v5241_v37, %v5242_v41  ;;  %v5244_v49 = vld [vmem:[#allocation34_spill] sm:$0xff]  ;;  %v1794_v37 = vld [vmem:[#allocation6 + $0x88] sm:$0xff] }
 0x673   :  { %3302 = vmatpush1.bf16.msra.mxu0 %v4098_v53  ;;  %3334 = vmatpush1.bf16.msra.mxu1 %v4109_v57  ;;  %v5245_v53 = vld [vmem:[#allocation18_spill] sm:$0xff] }
 0x674   :  { %3304 = vmatprep.subr.bf16.mxu0 %v4123_v61  ;;  %3336 = vmatprep.subr.bf16.mxu1 %v4136_v3  ;;  %v5246_v54 = vsel %vm4382_vm4, %v5244_v49, %v5245_v53  ;;  %v5247_v3 = vld [vmem:[#allocation35_spill] sm:$0xff]  ;;  %v1795_v53 = vld [vmem:[#allocation6 + $0x90] sm:$0xff] }
 0x677   :  { %3306 = vmatpush1.bf16.msra.mxu0 %v4134_v2  ;;  %3338 = vmatpush1.bf16.msra.mxu1 %v4145_v6  ;;  %v5248_v6 = vld [vmem:[#allocation17_spill] sm:$0xff] }
 0x678   :  { %3308 = vmatprep.subr.bf16.mxu0 %v4159_v10  ;;  %3340 = vmatprep.subr.bf16.mxu1 %v4172_v15  ;;  %v5249_v10 = vsel %vm4372_vm3, %v5247_v3, %v5248_v6  ;;  %v5250_v15 = vld [vmem:[#allocation38_spill] sm:$0xff]  ;;  %v1802_v6 = vld [vmem:[#allocation6 + $0xc8] sm:$0xff] }
 0x67b   :  { %3310 = vmatpush1.bf16.msra.mxu0 %v4170_v14  ;;  %3342 = vmatpush1.bf16.msra.mxu1 %v4181_v18 }
 0x67c   :  { %3312 = vmatprep.subr.bf16.mxu0 %v4195_v22  ;;  %3344 = vmatprep.subr.bf16.mxu1 %v4208_v28 }
 0x67f   :  { %3314 = vmatpush1.bf16.msra.mxu0 %v4206_v27  ;;  %3346 = vmatpush1.bf16.msra.mxu1 %v4220_v35 }
 0x680   :  { %3316 = vmatprep.subr.bf16.mxu0 %v4233_v40  ;;  %3348 = vmatprep.subr.bf16.mxu1 %v4247_v48 }
 0x683   :  { %3318 = vmatpush1.bf16.msra.mxu0 %v4235_v43  ;;  %3350 = vmatpush1.bf16.msra.mxu1 %v4259_v55 }
 0x684   :  { %3320 = vmatprep.subr.bf16.mxu0 %v4261_v56  ;;  %3352 = vmatprep.subr.bf16.mxu1 %v4285_v5 }
 0x687   :  { %3322 = vmatpush1.bf16.msra.mxu0 %v4283_v4  ;;  %3354 = vmatpush1.bf16.msra.mxu1 %v4289_v7 }
 0x688   :  { %3356 = vmatprep.subr.bf16.mxu0 %v3355_v31  ;;  %3387 = vmatprep.subr.bf16.mxu1 %v3841_v58  ;;  %v1818_v31 = vld [vmem:[#allocation6 + $0x148] sm:$0xff] }
 0x73d   :  { %v1489_v29 = vpop.f32.mrb[26].mxu0  ;;  %v1560_v33 = vpop.f32.mrb[26].mxu1 }
 0x73e   :  { %v1565_v45 = vadd.f32 %v1489_v29, %v5243_v42  ;;  %v1567_v57 = vadd.f32 %v1560_v33, %v5246_v54  ;;  %v1491_v61 = vpop.f32.mrb[27].mxu0  ;;  %v1562_v2 = vpop.f32.mrb[27].mxu1  ;;  %v1791_v29 = vld [vmem:[#allocation6 + $0x70] sm:$0xff]  ;;  %v3365_v33 = vpack.c.bf16 %v1792_v63, %v1789_v39  ;;  %v1796_v42 = vld [vmem:[#allocation6 + $0x98] sm:$0xff]  ;;  %v1798_v54 = vld [vmem:[#allocation6 + $0xa8] sm:$0xff] }
 0x73f   :  { %v1566_v14 = vadd.f32 %v1491_v61, %v5249_v10  ;;  %v1568_v18 = vadd.f32 %v1562_v2, %v5250_v15  ;;  %v3394_v41 = vpack.c.bf16 %v1794_v37, %v1791_v29  ;;  %v3369_v61 = vpack.c.bf16 %v1798_v54, %v1795_v53  ;;  %v1800_v2 = vld [vmem:[#allocation6 + $0xb8] sm:$0xff]  ;;  %v1805_v10 = vld [vmem:[#allocation6 + $0xe0] sm:$0xff]  ;;  %v5251_v63 = vld [vmem:[#allocation37_spill] sm:$0xff] }
 0x740   :  { %v2666_v22 = vmul.f32 -1.442695, %v1565_v45  ;;  %v1799_v45 = vld [vmem:[#allocation6 + $0xb0] sm:$0xff]  ;;  %v1801_v15 = vld [vmem:[#allocation6 + $0xc0] sm:$0xff]  ;;  %v5252_v29 = vld [vmem:[#allocation36_spill] sm:$0xff] }
 0x741   :  { %v2667_v27 = vmul.f32 -1.442695, %v1566_v14  ;;  %v2668_v28 = vmul.f32 -1.442695, %v1568_v18  ;;  %v3367_v49 = vpack.c.bf16 %v1799_v45, %v1796_v42  ;;  %v3371_v14 = vpack.c.bf16 %v1805_v10, %v1802_v6  ;;  %v1804_v18 = vld [vmem:[#allocation6 + $0xd8] sm:$0xff]  ;;  %v5255_v42 = vld [vmem:[#allocation40_spill] sm:$0xff] }
 0x742   :  { %3730 = vpow2.f32 %v2666_v22  ;;  %v1803_v22 = vld [vmem:[#allocation6 + $0xd0] sm:$0xff]  ;;  %v5260_v6 = vld [vmem:[#allocation43_spill] sm:$0xff] }
 0x743   :  { %3732 = vpow2.f32 %v2667_v27  ;;  %v3373_v27 = vpack.c.bf16 %v1804_v18, %v1801_v15 }
 0x744   :  { %3734 = vpow2.f32 %v2668_v28  ;;  %v1806_v28 = vld [vmem:[#allocation6 + $0xe8] sm:$0xff] }
 0x745   :  { %3736 = vtanh.f32 %v1567_v57  ;;  %v1797_v57 = vld [vmem:[#allocation6 + $0xa0] sm:$0xff] }
 0x746   :  { %v3397_v3 = vpack.c.bf16 %v1800_v2, %v1797_v57  ;;  %v5257_v57 = vld [vmem:[#allocation42_spill] sm:$0xff] }
 0x74c   :  { %v3731_v35 = vpop.eup %3730 }
 0x74d   :  { %v3733_v40 = vpop.eup %3732  ;;  %v1572_v43 = vadd.f32 1.0, %v3731_v35  ;;  %v1808_v35 = vld [vmem:[#allocation6 + $0xf8] sm:$0xff] }
 0x74e   :  { %v1578_v48 = vadd.f32 1.0, %v3733_v40  ;;  %v3735_v55 = vpop.eup %3734  ;;  %v1811_v40 = vld [vmem:[#allocation6 + $0x110] sm:$0xff] }
 0x74f   :  { %3738 = vrcp.f32 %v1572_v43  ;;  %v3737_v56 = vpop.eup %3736  ;;  %v1585_v8 = vadd.f32 1.0, %v3735_v55  ;;  %v3400_v43 = vpack.c.bf16 %v1806_v28, %v1803_v22  ;;  %v1807_v55 = vld [vmem:[#allocation6 + $0xf0] sm:$0xff] }
 0x750   :  { %3740 = vrcp.f32 %v1578_v48  ;;  %v3375_v48 = vpack.c.bf16 %v1811_v40, %v1808_v35 }
 0x751   :  { %3742 = vrcp.f32 %v1585_v8  ;;  %v1814_v8 = vld [vmem:[#allocation6 + $0x128] sm:$0xff] }
 0x759   :  { %v3739_v4 = vpop.eup %3738 }
 0x75a   :  { %v3741_v5 = vpop.eup %3740  ;;  %v1589_v7 = vmul.f32 %v3739_v4, %v3737_v56  ;;  %v1810_v56 = vld [vmem:[#allocation6 + $0x108] sm:$0xff]  ;;  %v1809_v4 = vld [vmem:[#allocation6 + $0x100] sm:$0xff] }
 0x75b   :  { %v1588_v62 = vmul.f32 %v3741_v5, %v4834_v0  ;;  %v3743_v1 = vpop.eup %3742  ;;  %v1793_v0 = vld [vmem:[#allocation6 + $0x80] sm:$0xff]  ;;  %v3377_v5 = vpack.c.bf16 %v1810_v56, %v1807_v55  ;;  %v1767_v56 = vld [vmem:[%s5114_s3] sm:$0x1] }
 0x75c   :  { %v3363_v46 = vpack.c.bf16 %v1793_v0, %v1790_v60  ;;  %v2039_v60 = vld [vmem:[#allocation8 + $0x1a8] sm:$0xff]  ;;  %vm1768_vm7 = vcmp.gt.f32.partialorder %v1767_v56, 0.5 }
 0x75d   :  { %v4886_v19 = vadd.f32 %v1589_v7, %v1588_v62  ;;  %v1812_v7 = vld [vmem:[#allocation6 + $0x118] sm:$0xff]  ;;  %v1817_v62 = vld [vmem:[#allocation6 + $0x140] sm:$0xff] }
 0x75f   :  { %3744 = vtanh.f32 %v4886_v19 }
 0x769   :  { %v3745_v34 = vpop.eup %3744 }
 0x76a   :  { %v1592_v47 = vmul.f32 %v3745_v34, %v3743_v1  ;;  %v3403_v1 = vpack.c.bf16 %v1812_v7, %v1809_v4  ;;  %v3379_v34 = vpack.c.bf16 %v1817_v62, %v1814_v8  ;;  %v5262_v8 = vld [vmem:[#allocation13_spill] sm:$0xff] }
 0x76c   :  { %1662 = vmatmul.mubr.f32.vlgmr.msra.gmra.mrb[28].mxu0 %v1592_v47  ;;  %1733 = vmatmul.mubr.f32.vlgmr.msra.gmra.mrb[28].mxu1 %v1592_v47  ;;  %v1813_v47 = vld [vmem:[#allocation6 + $0x120] sm:$0xff] }
 0x76d   :  { %1906 = vmatprep.mubr.f32.mxu0 %v5207_v59  ;;  %3358 = vmatpush1.bf16.msra.mxu0 %v3357_v25  ;;  %v3381_v9 = vpack.c.bf16 %v1816_v12, %v1813_v47  ;;  %v3406_v25 = vpack.c.bf16 %v1818_v31, %v1815_v44  ;;  %v1989_v47 = vld [vmem:[#allocation8 + $0x18] sm:$0xff]  ;;  %v1988_v31 = vld [vmem:[#allocation8 + $0x10] sm:$0xff] }
 0x76e   :  { %3389 = vmatpush3.bf16.msra.mxu1 %v3388_v52  ;;  %3360 = vmatprep.subr.bf16.mxu0 %v3359_v30  ;;  %v1819_v52 = vld [vmem:[#allocation6 + $0x150] sm:$0xff]  ;;  %v1824_v30 = vld [vmem:[#allocation6 + $0x178] sm:$0xff] }
 0x76f   :  { %3390 = vmatprep.subr.bf16.mxu1 %v3841_v58  ;;  %2826 = vmatprep.mubr.msk.f32.mxu1 %vm3842_vm6, %v5207_v59  ;;  %v3385_v38 = vpack.c.bf16 %v1822_v36, %v1819_v52  ;;  %v3409_v13 = vpack.c.bf16 %v1824_v30, %v1821_v11  ;;  %v1993_v44 = vld [vmem:[#allocation8 + $0x38] sm:$0xff]  ;;  %v1992_v11 = vld [vmem:[#allocation8 + $0x30] sm:$0xff]  ;;  %v1995_v30 = vld [vmem:[#allocation8 + $0x48] sm:$0xff] }
 0x771   :  { %3362 = vmatpush1.bf16.msra.mxu0 %v3361_v21  ;;  %v1990_v21 = vld [vmem:[#allocation8 + $0x20] sm:$0xff] }
 0x772   :  { %3392 = vmatpush3.bf16.msra.mxu1 %v3391_v16  ;;  %3364 = vmatprep.subr.bf16.mxu0 %v3363_v46  ;;  %v3411_v51 = vpack.c.bf16 %v1990_v21, %v1987_v17  ;;  %v2036_v16 = vld [vmem:[#allocation8 + $0x190] sm:$0xff]  ;;  %v3415_v17 = vpack.c.bf16 %v1996_v24, %v1993_v44  ;;  %v1999_v21 = vld [vmem:[#allocation8 + $0x68] sm:$0xff]  ;;  %v2018_v24 = vld [vmem:[#allocation8 + $0x100] sm:$0xff] }
 0x773   :  { %3393 = vmatprep.subr.bf16.mxu1 %v3841_v58  ;;  %v3507_v0 = vpack.c.bf16 %v2039_v60, %v2036_v16  ;;  %v1994_v16 = vld [vmem:[#allocation8 + $0x40] sm:$0xff]  ;;  %v1997_v60 = vld [vmem:[#allocation8 + $0x58] sm:$0xff] }
 0x775   :  { %3366 = vmatpush1.bf16.msra.mxu0 %v3365_v33  ;;  %v5253_v33 = vsel %vm4365_vm2, %v5251_v63, %v5252_v29  ;;  %v3417_v63 = vpack.c.bf16 %v1995_v30, %v1992_v11  ;;  %v1998_v29 = vld [vmem:[#allocation8 + $0x60] sm:$0xff] }
 0x776   :  { %3395 = vmatpush3.bf16.msra.mxu1 %v3394_v41  ;;  %3368 = vmatprep.subr.bf16.mxu0 %v3367_v49  ;;  %v5254_v41 = vld [vmem:[#allocation41_spill] sm:$0xff]  ;;  %v2022_v11 = vld [vmem:[#allocation8 + $0x120] sm:$0xff] }
 0x777   :  { %3396 = vmatprep.subr.bf16.mxu1 %v3841_v58  ;;  %v5256_v45 = vsel %vm4382_vm4, %v5254_v41, %v5255_v42  ;;  %v2005_v42 = vld [vmem:[#allocation8 + $0x98] sm:$0xff] }
 0x779   :  { %3370 = vmatpush1.bf16.msra.mxu0 %v3369_v61  ;;  %v5258_v61 = vld [vmem:[#allocation39_spill] sm:$0xff] }
 0x77a   :  { %3398 = vmatpush3.bf16.msra.mxu1 %v3397_v3  ;;  %3372 = vmatprep.subr.bf16.mxu0 %v3371_v14  ;;  %v5259_v2 = vsel %vm4372_vm3, %v5257_v57, %v5258_v61  ;;  %v2054_v57 = vld [vmem:[#allocation8 + $0x220] sm:$0xff]  ;;  %v2057_v61 = vld [vmem:[#allocation8 + $0x238] sm:$0xff] }
 0x77b   :  { %3399 = vmatprep.subr.bf16.mxu1 %v3841_v58 }
 0x77d   :  { %3374 = vmatpush1.bf16.msra.mxu0 %v3373_v27 }
 0x77e   :  { %3401 = vmatpush3.bf16.msra.mxu1 %v3400_v43  ;;  %3376 = vmatprep.subr.bf16.mxu0 %v3375_v48 }
 0x77f   :  { %3402 = vmatprep.subr.bf16.mxu1 %v3841_v58 }
 0x781   :  { %3378 = vmatpush1.bf16.msra.mxu0 %v3377_v5  ;;  %v5261_v5 = vmov 0  }
 0x782   :  { %3404 = vmatpush3.bf16.msra.mxu1 %v3403_v1  ;;  %3380 = vmatprep.subr.bf16.mxu0 %v3379_v34  ;;  %v1769_v7 = vsel %vm1768_vm7, 1, %v5261_v5  ;;  %v1986_v34 = vld [vmem:[#allocation8] sm:$0xff]  ;;  %v2015_v5 = vld [vmem:[#allocation8 + $0xe8] sm:$0xff] }
 0x783   :  { %3405 = vmatprep.subr.bf16.mxu1 %v3841_v58  ;;  %v1773_v62 = vrot.slane %v1769_v7, %v5262_v8  ;;  %v3413_v36 = vpack.c.bf16 %v1989_v47, %v1986_v34  ;;  %v2020_v7 = vld [vmem:[#allocation8 + $0x110] sm:$0xff] }
 0x784   :  { %v2016_v47 = vld [vmem:[#allocation8 + $0xf0] sm:$0xff] }
 0x785   :  { %3382 = vmatpush1.bf16.msra.mxu0 %v3381_v9  ;;  %vm1774_vm8 = vcmp.eq.s32.totalorder %v1773_v62, 1  ;;  %v2042_v9 = vld [vmem:[#allocation8 + $0x1c0] sm:$0xff] }
 0x786   :  { %3407 = vmatpush3.bf16.msra.mxu1 %v3406_v25  ;;  %3384 = vmatprep.subr.bf16.mxu0 %v3383_v23  ;;  %v2045_v25 = vld [vmem:[#allocation8 + $0x1d8] sm:$0xff]  ;;  %v5263_v23 = vld [vmem:[#allocation44_spill] sm:$0xff]  ;;  %v2066_v62 = vld [vmem:[#allocation8 + $0x280] sm:$0xff] }
 0x787   :  { %3408 = vmatprep.subr.bf16.mxu1 %v3841_v58 }
 0x789   :  { %3386 = vmatpush1.bf16.msra.mxu0 %v3385_v38 }
 0x78a   :  { %3410 = vmatpush3.bf16.msra.mxu1 %v3409_v13  ;;  %3412 = vmatprep.subr.bf16.mxu0 %v3411_v51  ;;  %v3511_v51 = vpack.c.bf16 %v2045_v25, %v2042_v9  ;;  %v2021_v9 = vld [vmem:[#allocation8 + $0x118] sm:$0xff]  ;;  %v2026_v25 = vld [vmem:[#allocation8 + $0x140] sm:$0xff] }
 0x78b   :  { %3508 = vmatprep.subr.bf16.mxu1 %v3507_v0  ;;  %v2002_v0 = vld [vmem:[#allocation8 + $0x80] sm:$0xff]  ;;  %v3529_v30 = vpack.c.bf16 %v2021_v9, %v2018_v24  ;;  %v2073_v24 = vld [vmem:[#allocation8 + $0x2b8] sm:$0xff] }
 0x78c   :  { %v3419_v41 = vpack.c.bf16 %v2002_v0, %v1999_v21  ;;  %v2024_v21 = vld [vmem:[#allocation8 + $0x130] sm:$0xff] }
 0x83f   :  { %v1663_v46 = vpop.f32.mrb[28].mxu0  ;;  %v1734_v39 = vpop.f32.mrb[28].mxu1 }
 0x840   :  { %v1739_v37 = vadd.f32 %v1663_v46, %v5253_v33  ;;  %v1741_v49 = vadd.f32 %v1734_v39, %v5256_v45  ;;  %v1665_v53 = vpop.f32.mrb[29].mxu0  ;;  %v1736_v54 = vpop.f32.mrb[29].mxu1  ;;  %v2048_v46 = vld [vmem:[#allocation8 + $0x1f0] sm:$0xff]  ;;  %v2051_v39 = vld [vmem:[#allocation8 + $0x208] sm:$0xff]  ;;  %v2001_v33 = vld [vmem:[#allocation8 + $0x78] sm:$0xff] }
 0x841   :  { %v1740_v3 = vadd.f32 %v1665_v53, %v5259_v2  ;;  %v1742_v26 = vadd.f32 %v1736_v54, %v5260_v6  ;;  %v3515_v45 = vpack.c.bf16 %v2051_v39, %v2048_v46  ;;  %v2003_v53 = vld [vmem:[#allocation8 + $0x88] sm:$0xff]  ;;  %v2008_v54 = vld [vmem:[#allocation8 + $0xb0] sm:$0xff]  ;;  %v3421_v2 = vpack.c.bf16 %v2001_v33, %v1998_v29 }
 0x842   :  { %v2669_v10 = vmul.f32 -1.442695, %v1739_v37  ;;  %v3513_v37 = vpack.c.bf16 %v1997_v60, %v1994_v16  ;;  %v2007_v6 = vld [vmem:[#allocation8 + $0xa8] sm:$0xff]  ;;  %v2029_v16 = vld [vmem:[#allocation8 + $0x158] sm:$0xff]  ;;  %v2032_v60 = vld [vmem:[#allocation8 + $0x170] sm:$0xff] }
 0x843   :  { %v2670_v14 = vmul.f32 -1.442695, %v1740_v3  ;;  %v2671_v15 = vmul.f32 -1.442695, %v1742_v26  ;;  %v2004_v3 = vld [vmem:[#allocation8 + $0x90] sm:$0xff]  ;;  %v3439_v39 = vpack.c.bf16 %v2032_v60, %v2029_v16  ;;  %v2031_v29 = vld [vmem:[#allocation8 + $0x168] sm:$0xff] }
 0x844   :  { %3746 = vpow2.f32 %v2669_v10  ;;  %v3423_v10 = vpack.c.bf16 %v2008_v54, %v2005_v42  ;;  %v2035_v33 = vld [vmem:[#allocation8 + $0x188] sm:$0xff]  ;;  %v2044_v54 = vld [vmem:[#allocation8 + $0x1d0] sm:$0xff] }
 0x845   :  { %3748 = vpow2.f32 %v2670_v14  ;;  %v2011_v14 = vld [vmem:[#allocation8 + $0xc8] sm:$0xff] }
 0x846   :  { %3750 = vpow2.f32 %v2671_v15  ;;  %v3519_v15 = vpack.c.bf16 %v2057_v61, %v2054_v57  ;;  %v2083_v60 = vld [vmem:[#allocation8 + $0x308] sm:$0xff] }
 0x847   :  { %3752 = vtanh.f32 %v1741_v49  ;;  %v2000_v49 = vld [vmem:[#allocation8 + $0x70] sm:$0xff] }
 0x848   :  { %v3517_v26 = vpack.c.bf16 %v2003_v53, %v2000_v49  ;;  %v2037_v49 = vld [vmem:[#allocation8 + $0x198] sm:$0xff] }
 0x849   :  { %v2041_v53 = vld [vmem:[#allocation8 + $0x1b8] sm:$0xff] }
 0x84a   :  { %v3447_v61 = vpack.c.bf16 %v2044_v54, %v2041_v53  ;;  %v2085_v54 = vld [vmem:[#allocation8 + $0x318] sm:$0xff] }
 0x84e   :  { %v3747_v32 = vpop.eup %3746 }
 0x84f   :  { %v3749_v18 = vpop.eup %3748  ;;  %v1746_v22 = vadd.f32 1.0, %v3747_v32  ;;  %v2006_v32 = vld [vmem:[#allocation8 + $0xa0] sm:$0xff] }
 0x850   :  { %v1752_v27 = vadd.f32 1.0, %v3749_v18  ;;  %v3751_v50 = vpop.eup %3750  ;;  %v2009_v18 = vld [vmem:[#allocation8 + $0xb8] sm:$0xff] }
 0x851   :  { %3754 = vrcp.f32 %v1746_v22  ;;  %v3753_v28 = vpop.eup %3752  ;;  %v1759_v48 = vadd.f32 1.0, %v3751_v50  ;;  %v2014_v22 = vld [vmem:[#allocation8 + $0xe0] sm:$0xff]  ;;  %v2063_v50 = vld [vmem:[#allocation8 + $0x268] sm:$0xff] }
 0x852   :  { %3756 = vrcp.f32 %v1752_v27  ;;  %v2060_v27 = vld [vmem:[#allocation8 + $0x250] sm:$0xff] }
 0x853   :  { %3758 = vrcp.f32 %v1759_v48  ;;  %v3427_v48 = vpack.c.bf16 %v2014_v22, %v2011_v14  ;;  %v3523_v56 = vpack.c.bf16 %v2063_v50, %v2060_v27  ;;  %v2056_v22 = vld [vmem:[#allocation8 + $0x230] sm:$0xff] }
 0x85b   :  { %v3755_v35 = vpop.eup %3754 }
 0x85c   :  { %v3757_v40 = vpop.eup %3756  ;;  %v1763_v43 = vmul.f32 %v3755_v35, %v3753_v28  ;;  %v3425_v28 = vpack.c.bf16 %v2007_v6, %v2004_v3  ;;  %v2010_v35 = vld [vmem:[#allocation8 + $0xc0] sm:$0xff]  ;;  %v2043_v3 = vld [vmem:[#allocation8 + $0x1c8] sm:$0xff] }
 0x85d   :  { %v1762_v55 = vmul.f32 %v3757_v40, %v4886_v19  ;;  %v3759_v1 = vpop.eup %3758  ;;  %v1991_v19 = vld [vmem:[#allocation8 + $0x28] sm:$0xff]  ;;  %v2013_v40 = vld [vmem:[#allocation8 + $0xd8] sm:$0xff] }
 0x85e   :  { %v3509_v38 = vpack.c.bf16 %v1991_v19, %v1988_v31  ;;  %v3429_v34 = vpack.c.bf16 %v2013_v40, %v2010_v35  ;;  %v2023_v19 = vld [vmem:[#allocation8 + $0x128] sm:$0xff] }
 0x85f   :  { %v1764_v4 = vadd.f32 %v1763_v43, %v1762_v55  ;;  %v3521_v43 = vpack.c.bf16 %v2009_v18, %v2006_v32  ;;  %v2017_v55 = vld [vmem:[#allocation8 + $0xf8] sm:$0xff]  ;;  %v2047_v6 = vld [vmem:[#allocation8 + $0x1e8] sm:$0xff] }
 0x860   :  { %v3431_v31 = vpack.c.bf16 %v2020_v7, %v2017_v55  ;;  %v2049_v32 = vld [vmem:[#allocation8 + $0x1f8] sm:$0xff]  ;;  %v2055_v35 = vld [vmem:[#allocation8 + $0x228] sm:$0xff]  ;;  %v2068_v7 = vld [vmem:[#allocation8 + $0x290] sm:$0xff] }
 0x861   :  { %3760 = vtanh.f32 %v1764_v4  ;;  %v2012_v4 = vld [vmem:[#allocation8 + $0xd0] sm:$0xff]  ;;  %v2053_v18 = vld [vmem:[#allocation8 + $0x218] sm:$0xff]  ;;  %v2059_v40 = vld [vmem:[#allocation8 + $0x248] sm:$0xff] }
 0x862   :  { %v3525_v44 = vpack.c.bf16 %v2015_v5, %v2012_v4  ;;  %v3455_v50 = vpack.c.bf16 %v2056_v22, %v2053_v18  ;;  %v2061_v4 = vld [vmem:[#allocation8 + $0x258] sm:$0xff]  ;;  %v2091_v22 = vld [vmem:[#allocation8 + $0x348] sm:$0xff] }
 0x863   :  { %v2065_v5 = vld [vmem:[#allocation8 + $0x278] sm:$0xff] }
 0x86b   :  { %v3761_v12 = vpop.eup %3760 }
 0x86c   :  { %v1766_v20 = vmul.f32 %v3761_v12, %v3759_v1  ;;  %v2069_v1 = vld [vmem:[#allocation8 + $0x298] sm:$0xff]  ;;  %v2019_v12 = vld [vmem:[#allocation8 + $0x108] sm:$0xff] }
 0x86e   :  { %v1775_v52 = vsel %vm1774_vm8, %v1766_v20, %v5263_v23  ;;  %v3527_v20 = vpack.c.bf16 %v2069_v1, %v2066_v62  ;;  %v2072_v23 = vld [vmem:[#allocation8 + $0x2b0] sm:$0xff]  ;;  %v3463_v1 = vpack.c.bf16 %v2068_v7, %v2065_v5  ;;  %v2099_v5 = vld [vmem:[#allocation8 + $0x388] sm:$0xff]  ;;  %v2101_v7 = vld [vmem:[#allocation8 + $0x398] sm:$0xff] }
 0x86f   :  { %v1776_v13 = vmax.f32 %v1775_v52, 0.0  ;;  %v2075_v52 = vld [vmem:[#allocation8 + $0x2c8] sm:$0xff] }
 0x871   :  { %1907 = vmatmul.mubr.f32.vlgmr.msra.gmra.mrb[30].mxu0 %v1776_v13  ;;  %2827 = vmatmul.mubr.f32.vlgmr.msra.gmra.mrb[30].mxu1 %v1776_v13  ;;  %v2025_v13 = vld [vmem:[#allocation8 + $0x138] sm:$0xff] }
 0x872   :  { %3414 = vmatpush1.bf16.msra.mxu0 %v3413_v36  ;;  %3510 = vmatpush3.bf16.msra.mxu1 %v3509_v38  ;;  %v3433_v36 = vpack.c.bf16 %v2019_v12, %v2016_v47  ;;  %v3435_v38 = vpack.c.bf16 %v2026_v25, %v2023_v19  ;;  %v3437_v0 = vpack.c.bf16 %v2025_v13, %v2022_v11  ;;  %v2067_v47 = vld [vmem:[#allocation8 + $0x288] sm:$0xff]  ;;  %v2077_v25 = vld [vmem:[#allocation8 + $0x2d8] sm:$0xff] }
 0x873   :  { %3416 = vmatprep.subr.bf16.mxu0 %v3415_v17  ;;  %3512 = vmatprep.subr.bf16.mxu1 %v3511_v51  ;;  %v3531_v17 = vpack.c.bf16 %v2075_v52, %v2072_v23  ;;  %v2027_v51 = vld [vmem:[#allocation8 + $0x148] sm:$0xff]  ;;  %v2080_v23 = vld [vmem:[#allocation8 + $0x2f0] sm:$0xff]  ;;  %v2078_v52 = vld [vmem:[#allocation8 + $0x2e0] sm:$0xff] }
 0x874   :  { %v3533_v46 = vpack.c.bf16 %v2027_v51, %v2024_v21  ;;  %v2071_v12 = vld [vmem:[#allocation8 + $0x2a8] sm:$0xff]  ;;  %v2081_v11 = vld [vmem:[#allocation8 + $0x2f8] sm:$0xff]  ;;  %v2030_v21 = vld [vmem:[#allocation8 + $0x160] sm:$0xff] }
 0x875   :  { %v3535_v13 = vpack.c.bf16 %v2081_v11, %v2078_v52  ;;  %v2033_v51 = vld [vmem:[#allocation8 + $0x178] sm:$0xff]  ;;  %v2108_v11 = vld [vmem:[#allocation8 + $0x3d0] sm:$0xff] }
 0x876   :  { %3418 = vmatpush1.bf16.msra.mxu0 %v3417_v63  ;;  %3514 = vmatpush3.bf16.msra.mxu1 %v3513_v37  ;;  %v2028_v63 = vld [vmem:[#allocation8 + $0x150] sm:$0xff]  ;;  %v2038_v37 = vld [vmem:[#allocation8 + $0x1a0] sm:$0xff]  ;;  %v3537_v16 = vpack.c.bf16 %v2033_v51, %v2030_v21 }
 0x877   :  { %3420 = vmatprep.subr.bf16.mxu0 %v3419_v41  ;;  %3516 = vmatprep.subr.bf16.mxu1 %v3515_v45  ;;  %v3441_v41 = vpack.c.bf16 %v2031_v29, %v2028_v63  ;;  %v3443_v42 = vpack.c.bf16 %v2038_v37, %v2035_v33  ;;  %v2034_v45 = vld [vmem:[#allocation8 + $0x180] sm:$0xff]  ;;  %v5264_v29 = vld [vmem:[#allocation14_spill] sm:$0xff]  ;;  %v2112_v51 = vld [vmem:[#allocation8 + $0x3f0] sm:$0xff] }
 0x878   :  { %v3445_v57 = vpack.c.bf16 %v2037_v49, %v2034_v45 }
 0x87a   :  { %3422 = vmatpush1.bf16.msra.mxu0 %v3421_v2  ;;  %3518 = vmatpush3.bf16.msra.mxu1 %v3517_v26  ;;  %v2040_v2 = vld [vmem:[#allocation8 + $0x1b0] sm:$0xff]  ;;  %v2050_v26 = vld [vmem:[#allocation8 + $0x200] sm:$0xff] }
 0x87b   :  { %3424 = vmatprep.subr.bf16.mxu0 %v3423_v10  ;;  %3520 = vmatprep.subr.bf16.mxu1 %v3519_v15  ;;  %v3449_v10 = vpack.c.bf16 %v2043_v3, %v2040_v2  ;;  %v3451_v14 = vpack.c.bf16 %v2050_v26, %v2047_v6  ;;  %v2046_v15 = vld [vmem:[#allocation8 + $0x1e0] sm:$0xff]  ;;  %v2089_v3 = vld [vmem:[#allocation8 + $0x338] sm:$0xff]  ;;  %v2092_v6 = vld [vmem:[#allocation8 + $0x350] sm:$0xff] }
 0x87c   :  { %v3453_v27 = vpack.c.bf16 %v2049_v32, %v2046_v15  ;;  %v2088_v15 = vld [vmem:[#allocation8 + $0x330] sm:$0xff]  ;;  %v3479_v18 = vpack.c.bf16 %v2092_v6, %v2089_v3 }
 0x87e   :  { %3426 = vmatpush1.bf16.msra.mxu0 %v3425_v28  ;;  %3522 = vmatpush3.bf16.msra.mxu1 %v3521_v43  ;;  %v2052_v28 = vld [vmem:[#allocation8 + $0x210] sm:$0xff]  ;;  %v2062_v43 = vld [vmem:[#allocation8 + $0x260] sm:$0xff] }
 0x87f   :  { %3428 = vmatprep.subr.bf16.mxu0 %v3427_v48  ;;  %3524 = vmatprep.subr.bf16.mxu1 %v3523_v56  ;;  %v3457_v48 = vpack.c.bf16 %v2055_v35, %v2052_v28  ;;  %v3459_v55 = vpack.c.bf16 %v2062_v43, %v2059_v40  ;;  %v2058_v56 = vld [vmem:[#allocation8 + $0x240] sm:$0xff]  ;;  %v2095_v28 = vld [vmem:[#allocation8 + $0x368] sm:$0xff]  ;;  %v3481_v40 = vpack.c.bf16 %v2091_v22, %v2088_v15  ;;  %v2129_v22 = vld [vmem:[#allocation8 + $0x478] sm:$0xff] }
 0x880   :  { %v3461_v62 = vpack.c.bf16 %v2061_v4, %v2058_v56  ;;  %v2098_v35 = vld [vmem:[#allocation8 + $0x380] sm:$0xff]  ;;  %v2097_v56 = vld [vmem:[#allocation8 + $0x378] sm:$0xff]  ;;  %v2096_v4 = vld [vmem:[#allocation8 + $0x370] sm:$0xff] }
 0x882   :  { %3430 = vmatpush1.bf16.msra.mxu0 %v3429_v34  ;;  %3526 = vmatpush3.bf16.msra.mxu1 %v3525_v44  ;;  %v2064_v34 = vld [vmem:[#allocation8 + $0x270] sm:$0xff]  ;;  %v2074_v44 = vld [vmem:[#allocation8 + $0x2c0] sm:$0xff] }
 0x883   :  { %3432 = vmatprep.subr.bf16.mxu0 %v3431_v31  ;;  %3528 = vmatprep.subr.bf16.mxu1 %v3527_v20  ;;  %v3465_v31 = vpack.c.bf16 %v2067_v47, %v2064_v34  ;;  %v3467_v19 = vpack.c.bf16 %v2074_v44, %v2071_v12  ;;  %v2070_v20 = vld [vmem:[#allocation8 + $0x2a0] sm:$0xff]  ;;  %v3546_v34 = vpack.c.bf16 %v2099_v5, %v2096_v4  ;;  %v2100_v47 = vld [vmem:[#allocation8 + $0x390] sm:$0xff]  ;;  %v2103_v44 = vld [vmem:[#allocation8 + $0x3a8] sm:$0xff] }
 0x884   :  { %v3469_v9 = vpack.c.bf16 %v2073_v24, %v2070_v20  ;;  %v2107_v20 = vld [vmem:[#allocation8 + $0x3c8] sm:$0xff]  ;;  %v2110_v24 = vld [vmem:[#allocation8 + $0x3e0] sm:$0xff] }
 0x885   :  { %v3491_v52 = vpack.c.bf16 %v2110_v24, %v2107_v20  ;;  %v2463_v5 = vld [vmem:[%s5120_s9 + $0x110] sm:$0xff]  ;;  %v2449_v20 = vld [vmem:[%s5120_s9 + $0xa0] sm:$0xff] }
 0x886   :  { %3434 = vmatpush1.bf16.msra.mxu0 %v3433_v36  ;;  %3530 = vmatpush3.bf16.msra.mxu1 %v3529_v30  ;;  %v3471_v36 = vpack.c.bf16 %v2080_v23, %v2077_v25  ;;  %v2076_v30 = vld [vmem:[#allocation8 + $0x2d0] sm:$0xff]  ;;  %v2106_v23 = vld [vmem:[#allocation8 + $0x3c0] sm:$0xff] }
 0x887   :  { %3436 = vmatprep.subr.bf16.mxu0 %v3435_v38  ;;  %3532 = vmatprep.subr.bf16.mxu1 %v3531_v17  ;;  %v2079_v38 = vld [vmem:[#allocation8 + $0x2e8] sm:$0xff] }
 0x888   :  { %v3473_v17 = vpack.c.bf16 %v2079_v38, %v2076_v30  ;;  %v2111_v30 = vld [vmem:[#allocation8 + $0x3e8] sm:$0xff]  ;;  %v2113_v38 = vld [vmem:[#allocation8 + $0x3f8] sm:$0xff] }
 0x889   :  { %v3552_v21 = vpack.c.bf16 %v2111_v30, %v2108_v11  ;;  %v2451_v11 = vld [vmem:[%s5120_s9 + $0xb0] sm:$0xff]  ;;  %v2452_v30 = vld [vmem:[%s5120_s9 + $0xb8] sm:$0xff] }
 0x88a   :  { %3438 = vmatpush1.bf16.msra.mxu0 %v3437_v0  ;;  %3534 = vmatpush3.bf16.msra.mxu1 %v3533_v46  ;;  %v2086_v0 = vld [vmem:[#allocation8 + $0x320] sm:$0xff] }
 0x88b   :  { %3440 = vmatprep.subr.bf16.mxu0 %v3439_v39  ;;  %3536 = vmatprep.subr.bf16.mxu1 %v3535_v13  ;;  %v3475_v46 = vpack.c.bf16 %v2086_v0, %v2083_v60  ;;  %v4927_v39 = vld [vmem:[%s5117_s6] sm:$0x7]  ;;  %v2116_v13 = vld [vmem:[#allocation8 + $0x410] sm:$0xff]  ;;  %v2115_v60 = vld [vmem:[#allocation8 + $0x408] sm:$0xff] }
 0x88c   :  { %v1830_v63 = vrot.slane %v4927_v39, %v5262_v8  ;;  %v1834_v33 = vrot.slane %v4927_v39, %v5264_v29  ;;  %v2114_v0 = vld [vmem:[#allocation8 + $0x400] sm:$0xff] }
 0x88e   :  { %3442 = vmatpush1.bf16.msra.mxu0 %v3441_v41  ;;  %3538 = vmatpush3.bf16.msra.mxu1 %v3537_v16  ;;  %v3495_v16 = vpack.c.bf16 %v2116_v13, %v2113_v38  ;;  %v2467_v38 = vld [vmem:[%s5120_s9 + $0x130] sm:$0xff]  ;;  %v2468_v13 = vld [vmem:[%s5120_s9 + $0x138] sm:$0xff] }
 0x88f   :  { %3444 = vmatprep.subr.bf16.mxu0 %v3443_v42  ;;  %3539 = vmatprep.subr.bf16.mxu1 %v3841_v58  ;;  %v2082_v42 = vld [vmem:[#allocation8 + $0x300] sm:$0xff] }
 0x892   :  { %3446 = vmatpush1.bf16.msra.mxu0 %v3445_v57  ;;  %v2084_v57 = vld [vmem:[#allocation8 + $0x310] sm:$0xff] }
 0x893   :  { %3448 = vmatprep.subr.bf16.mxu0 %v3447_v61  ;;  %v2087_v61 = vld [vmem:[#allocation8 + $0x328] sm:$0xff] }
 0x896   :  { %3450 = vmatpush1.bf16.msra.mxu0 %v3449_v10  ;;  %v3477_v10 = vpack.c.bf16 %v2085_v54, %v2082_v42  ;;  %v2120_v54 = vld [vmem:[#allocation8 + $0x430] sm:$0xff] }
 0x897   :  { %3452 = vmatprep.subr.bf16.mxu0 %v3451_v14  ;;  %v3540_v14 = vpack.c.bf16 %v2087_v61, %v2084_v57  ;;  %v2123_v57 = vld [vmem:[#allocation8 + $0x448] sm:$0xff]  ;;  %v2125_v61 = vld [vmem:[#allocation8 + $0x458] sm:$0xff] }
 0x898   :  { %v3558_v6 = vpack.c.bf16 %v2123_v57, %v2120_v54  ;;  %v2455_v54 = vld [vmem:[%s5120_s9 + $0xd0] sm:$0xff]  ;;  %v2456_v57 = vld [vmem:[%s5120_s9 + $0xd8] sm:$0xff] }
 0x89a   :  { %3454 = vmatpush1.bf16.msra.mxu0 %v3453_v27  ;;  %v2090_v27 = vld [vmem:[#allocation8 + $0x340] sm:$0xff] }
 0x89b   :  { %3456 = vmatprep.subr.bf16.mxu0 %v3455_v50  ;;  %v2093_v50 = vld [vmem:[#allocation8 + $0x358] sm:$0xff] }
 0x89c   :  { %v3543_v43 = vpack.c.bf16 %v2093_v50, %v2090_v27 }
 0x89e   :  { %3458 = vmatpush1.bf16.msra.mxu0 %v3457_v48  ;;  %v2094_v48 = vld [vmem:[#allocation8 + $0x360] sm:$0xff] }
 0x89f   :  { %3460 = vmatprep.subr.bf16.mxu0 %v3459_v55  ;;  %v3483_v55 = vpack.c.bf16 %v2098_v35, %v2095_v28 }
 0x8a2   :  { %3462 = vmatpush1.bf16.msra.mxu0 %v3461_v62  ;;  %v2104_v62 = vld [vmem:[#allocation8 + $0x3b0] sm:$0xff] }
 0x8a3   :  { %3464 = vmatprep.subr.bf16.mxu0 %v3463_v1  ;;  %v3485_v1 = vpack.c.bf16 %v2097_v56, %v2094_v48  ;;  %v3487_v12 = vpack.c.bf16 %v2104_v62, %v2101_v7  ;;  %v2446_v48 = vld [vmem:[%s5120_s9 + $0x88] sm:$0xff]  ;;  %v2464_v7 = vld [vmem:[%s5120_s9 + $0x118] sm:$0xff]  ;;  %v2447_v62 = vld [vmem:[%s5120_s9 + $0x90] sm:$0xff] }
 0x8a6   :  { %3466 = vmatpush1.bf16.msra.mxu0 %v3465_v31  ;;  %v2102_v31 = vld [vmem:[#allocation8 + $0x3a0] sm:$0xff] }
 0x8a7   :  { %3468 = vmatprep.subr.bf16.mxu0 %v3467_v19  ;;  %v2105_v19 = vld [vmem:[#allocation8 + $0x3b8] sm:$0xff] }
 0x8a8   :  { %v3549_v25 = vpack.c.bf16 %v2105_v19, %v2102_v31  ;;  %v2465_v31 = vld [vmem:[%s5120_s9 + $0x120] sm:$0xff]  ;;  %v2466_v19 = vld [vmem:[%s5120_s9 + $0x128] sm:$0xff] }
 0x8aa   :  { %3470 = vmatpush1.bf16.msra.mxu0 %v3469_v9  ;;  %v3489_v9 = vpack.c.bf16 %v2103_v44, %v2100_v47  ;;  %v2431_v47 = vld [vmem:[%s5120_s9 + $0x10] sm:$0xff] }
 0x8ab   :  { %3472 = vmatprep.subr.bf16.mxu0 %v3471_v36  ;;  %v2109_v36 = vld [vmem:[#allocation8 + $0x3d8] sm:$0xff] }
 0x8ae   :  { %3474 = vmatpush1.bf16.msra.mxu0 %v3473_v17  ;;  %v3493_v17 = vpack.c.bf16 %v2109_v36, %v2106_v23  ;;  %v2433_v23 = vld [vmem:[%s5120_s9 + $0x20] sm:$0xff]  ;;  %v3602_v36 = vpack.c.bf16 %v2466_v19, %v2465_v31 }
 0x8af   :  { %3476 = vmatprep.subr.bf16.mxu0 %v3475_v46  ;;  %v2117_v46 = vld [vmem:[#allocation8 + $0x418] sm:$0xff] }
 0x8b0   :  { %v3555_v42 = vpack.c.bf16 %v2117_v46, %v2114_v0  ;;  %v2453_v0 = vld [vmem:[%s5120_s9 + $0xc0] sm:$0xff]  ;;  %v2454_v46 = vld [vmem:[%s5120_s9 + $0xc8] sm:$0xff] }
 0x944   :  { %v1908_v37 = vpop.f32.mrb[30].mxu0  ;;  %v4933_v41 = vpop.f32.mrb[30].mxu1 }
 0x945   :  { %v1909_v45 = vadd.f32 %v1908_v37, %v1830_v63  ;;  %v1910_v49 = vpop.f32.mrb[31].mxu0  ;;  %v2828_v53 = vpop.f32.mrb[31].mxu1  ;;  %v2119_v63 = vld [vmem:[#allocation8 + $0x428] sm:$0xff]  ;;  %v3497_v37 = vpack.c.bf16 %v2115_v60, %v2112_v51  ;;  %v3605_v60 = vpack.c.bf16 %v2468_v13, %v2467_v38  ;;  %v2672_v13 = vld [vmem:[#allocation3] ss:$0 sm:$0xff] }
 0x946   :  { %v1911_v2 = vadd.f32 %v1910_v49, %v1834_v33  ;;  %v2122_v33 = vld [vmem:[#allocation8 + $0x440] sm:$0xff]  ;;  %v2121_v53 = vld [vmem:[#allocation8 + $0x438] sm:$0xff]  ;;  %v2435_v51 = vld [vmem:[%s5120_s9 + $0x30] sm:$0xff] }
 0x947   :  { %v1983_v32 = vmax.f32 %v1909_v45, 0.0  ;;  %v2118_v45 = vld [vmem:[#allocation8 + $0x420] sm:$0xff]  ;;  %v3499_v49 = vpack.c.bf16 %v2122_v33, %v2119_v63 }
 0x948   :  { %v1984_v26 = vmax.f32 %v1911_v2, 0.0  ;;  %v2128_v2 = vld [vmem:[#allocation8 + $0x470] sm:$0xff]  ;;  %v3501_v3 = vpack.c.bf16 %v2121_v53, %v2118_v45  ;;  %v2469_v63 = vld [vmem:[%s5120_s9 + $0x140] sm:$0xff]  ;;  %v2470_v33 = vld [vmem:[%s5120_s9 + $0x148] sm:$0xff] }
 0x949   :  { %v3503_v15 = vpack.c.bf16 %v2128_v2, %v2125_v61  ;;  %v2437_v45 = vld [vmem:[%s5120_s9 + $0x40] sm:$0xff]  ;;  %v3608_v53 = vpack.c.bf16 %v2470_v33, %v2469_v63  ;;  %v2471_v61 = vld [vmem:[%s5120_s9 + $0x150] sm:$0xff]  ;;  %v2472_v2 = vld [vmem:[%s5120_s9 + $0x158] sm:$0xff] }
 0x94a   :  { %2211 = vmatprep.mubr.f32.mxu0 %v1984_v26  ;;  %2353 = vmatprep.mubr.f32.mxu1 %v1984_v26  ;;  %v2124_v26 = vld [vmem:[#allocation8 + $0x450] sm:$0xff] }
 0x94b   :  { %2212 = vmatmul.mubr.f32.vlgmr.msra.gmra.mrb[32].mxu0 %v1983_v32  ;;  %2354 = vmatmul.mubr.f32.vlgmr.msra.gmra.mrb[32].mxu1 %v1983_v32  ;;  %v2127_v32 = vld [vmem:[#allocation8 + $0x468] sm:$0xff] }
 0x94c   :  { %3478 = vmatpush1.bf16.msra.mxu0 %v3477_v10  ;;  %3541 = vmatpush3.bf16.msra.mxu1 %v3540_v14  ;;  %v5265_v10 = vld [vmem:[#allocation15_spill] sm:$0xff]  ;;  %v3505_v27 = vpack.c.bf16 %v2127_v32, %v2124_v26  ;;  %v2439_v26 = vld [vmem:[%s5120_s9 + $0x50] sm:$0xff] }
 0x94d   :  { %3480 = vmatprep.subr.bf16.mxu0 %v3479_v18  ;;  %3542 = vmatprep.subr.bf16.mxu1 %v3841_v58  ;;  %v1838_v14 = vrot.slane %v4927_v39, %v5265_v10  ;;  %v2126_v18 = vld [vmem:[#allocation8 + $0x460] sm:$0xff] }
 0x94e   :  { %2282 = vmatprep.mubr.f32.mxu0 %v5207_v59  ;;  %2861 = vmatprep.mubr.msk.f32.mxu1 %vm3842_vm6, %v5207_v59  ;;  %v3561_v50 = vpack.c.bf16 %v2129_v22, %v2126_v18  ;;  %v2461_v39 = vld [vmem:[%s5120_s9 + $0x100] sm:$0xff]  ;;  %v2458_v18 = vld [vmem:[%s5120_s9 + $0xe8] sm:$0xff] }
 0x94f   :  { %v1980_v28 = vadd.f32 %v4933_v41, %v1838_v14  ;;  %v2462_v41 = vld [vmem:[%s5120_s9 + $0x108] sm:$0xff]  ;;  %v2440_v14 = vld [vmem:[%s5120_s9 + $0x58] sm:$0xff]  ;;  %v2457_v32 = vld [vmem:[%s5120_s9 + $0xe0] sm:$0xff] }
 0x950   :  { %3482 = vmatpush1.bf16.msra.mxu0 %v3481_v40  ;;  %3544 = vmatpush3.bf16.msra.mxu1 %v3543_v43  ;;  %v2445_v40 = vld [vmem:[%s5120_s9 + $0x80] sm:$0xff]  ;;  %v3596_v43 = vpack.c.bf16 %v2462_v41, %v2461_v39  ;;  %v2442_v39 = vld [vmem:[%s5120_s9 + $0x68] sm:$0xff] }
 0x951   :  { %3484 = vmatprep.subr.bf16.mxu0 %v3483_v55  ;;  %3545 = vmatprep.subr.bf16.mxu1 %v3841_v58  ;;  %v1985_v35 = vmax.f32 %v1980_v28, 0.0  ;;  %v2430_v55 = vld [vmem:[%s5120_s9 + $0x8] sm:$0xff]  ;;  %v3563_v56 = vpack.c.bf16 %v2446_v48, %v2445_v40  ;;  %v2473_v22 = vld [vmem:[%s5120_s9 + $0x160] sm:$0xff]  ;;  %v3587_v28 = vpack.c.bf16 %v2458_v18, %v2457_v32  ;;  %v2476_v48 = vld [vmem:[%s5120_s9 + $0x178] sm:$0xff] }
 0x954   :  { %3486 = vmatpush1.bf16.msra.mxu0 %v3485_v1  ;;  %3547 = vmatpush3.bf16.msra.mxu1 %v3546_v34  ;;  %v3599_v1 = vpack.c.bf16 %v2464_v7, %v2463_v5  ;;  %v2448_v34 = vld [vmem:[%s5120_s9 + $0x98] sm:$0xff] }
 0x955   :  { %3488 = vmatprep.subr.bf16.mxu0 %v3487_v12  ;;  %3548 = vmatprep.subr.bf16.mxu1 %v3841_v58  ;;  %v2432_v12 = vld [vmem:[%s5120_s9 + $0x18] sm:$0xff]  ;;  %v3567_v44 = vpack.c.bf16 %v2448_v34, %v2447_v62 }
 0x956   :  { %v3569_v24 = vpack.c.bf16 %v2432_v12, %v2431_v47  ;;  %v2444_v5 = vld [vmem:[%s5120_s9 + $0x78] sm:$0xff]  ;;  %v2130_v47 = vld [vmem:[%s5119_s8] sm:$0x7] }
 0x957   :  { %v2143_v12 = vrot.slane %v2130_v47, %v5265_v10  ;;  %v2135_v31 = vrot.slane %v2130_v47, %v5262_v8 }
 0x958   :  { %3490 = vmatpush1.bf16.msra.mxu0 %v3489_v9  ;;  %3550 = vmatpush3.bf16.msra.mxu1 %v3549_v25  ;;  %v2450_v9 = vld [vmem:[%s5120_s9 + $0xa8] sm:$0xff] }
 0x959   :  { %3492 = vmatprep.subr.bf16.mxu0 %v3491_v52  ;;  %3551 = vmatprep.subr.bf16.mxu1 %v3841_v58  ;;  %v3571_v25 = vpack.c.bf16 %v2450_v9, %v2449_v20  ;;  %v2434_v52 = vld [vmem:[%s5120_s9 + $0x28] sm:$0xff] }
 0x95c   :  { %3494 = vmatpush1.bf16.msra.mxu0 %v3493_v17  ;;  %3553 = vmatpush3.bf16.msra.mxu1 %v3552_v21  ;;  %v3573_v17 = vpack.c.bf16 %v2434_v52, %v2433_v23  ;;  %v3575_v21 = vpack.c.bf16 %v2452_v30, %v2451_v11 }
 0x95d   :  { %3496 = vmatprep.subr.bf16.mxu0 %v3495_v16  ;;  %3554 = vmatprep.subr.bf16.mxu1 %v3841_v58  ;;  %v2436_v16 = vld [vmem:[%s5120_s9 + $0x38] sm:$0xff] }
 0x960   :  { %3498 = vmatpush1.bf16.msra.mxu0 %v3497_v37  ;;  %3556 = vmatpush3.bf16.msra.mxu1 %v3555_v42  ;;  %v3577_v37 = vpack.c.bf16 %v2436_v16, %v2435_v51  ;;  %v3579_v42 = vpack.c.bf16 %v2454_v46, %v2453_v0 }
 0x961   :  { %3500 = vmatprep.subr.bf16.mxu0 %v3499_v49  ;;  %3557 = vmatprep.subr.bf16.mxu1 %v3841_v58  ;;  %v2438_v49 = vld [vmem:[%s5120_s9 + $0x48] sm:$0xff] }
 0x964   :  { %3502 = vmatpush1.bf16.msra.mxu0 %v3501_v3  ;;  %3559 = vmatpush3.bf16.msra.mxu1 %v3558_v6  ;;  %v3581_v3 = vpack.c.bf16 %v2438_v49, %v2437_v45  ;;  %v3583_v6 = vpack.c.bf16 %v2456_v57, %v2455_v54 }
 0x965   :  { %3504 = vmatprep.subr.bf16.mxu0 %v3503_v15  ;;  %3560 = vmatprep.subr.bf16.mxu1 %v3841_v58  ;;  %v3611_v15 = vpack.c.bf16 %v2472_v2, %v2471_v61 }
 0x968   :  { %3506 = vmatpush1.bf16.msra.mxu0 %v3505_v27  ;;  %3562 = vmatpush3.bf16.msra.mxu1 %v3561_v50  ;;  %v2474_v27 = vld [vmem:[%s5120_s9 + $0x168] sm:$0xff]  ;;  %v3585_v50 = vpack.c.bf16 %v2440_v14, %v2439_v26 }
 0x969   :  { %3595 = vmatprep.subr.bf16.mxu0 %v3841_v58  ;;  %3564 = vmatprep.subr.bf16.mxu1 %v3563_v56  ;;  %v3614_v41 = vpack.c.bf16 %v2474_v27, %v2473_v22  ;;  %v2460_v56 = vld [vmem:[%s5120_s9 + $0xf8] sm:$0xff] }
 0x96b   :  { %2283 = vmatmul.mubr.f32.vlgmr.msra.gmra.mrb[32].mxu0 %v1985_v35  ;;  %2862 = vmatmul.mubr.f32.vlgmr.msra.gmra.mrb[34].mxu1 %v1985_v35  ;;  %v2441_v35 = vld [vmem:[%s5120_s9 + $0x60] sm:$0xff] }
 0x96c   :  { %2896 = vmatprep.mubr.msk.f32.mxu0 %vm3842_vm6, %v5207_v59  ;;  %v2429_v59 = vld [vmem:[%s5120_s9] sm:$0xff]  ;;  %3597 = vmatpush3.bf16.msra.mxu0 %v3596_v43  ;;  %v3589_v40 = vpack.c.bf16 %v2442_v39, %v2441_v35  ;;  %v2475_v43 = vld [vmem:[%s5120_s9 + $0x170] sm:$0xff] }
 0x96d   :  { %v3565_v4 = vpack.c.bf16 %v2430_v55, %v2429_v59  ;;  %3598 = vmatprep.subr.bf16.mxu0 %v3841_v58  ;;  %v3617_v59 = vpack.c.bf16 %v2476_v48, %v2475_v43  ;;  %v2459_v55 = vld [vmem:[%s5120_s9 + $0xf0] sm:$0xff] }
 0x96f   :  { %3566 = vmatpush3.bf16.msra.mxu1 %v3565_v4  ;;  %v3591_v4 = vpack.c.bf16 %v2460_v56, %v2459_v55 }
 0x970   :  { %3568 = vmatprep.subr.bf16.mxu1 %v3567_v44  ;;  %3600 = vmatpush3.bf16.msra.mxu0 %v3599_v1  ;;  %v2139_v44 = vrot.slane %v2130_v47, %v5264_v29 }
 0x971   :  { %3601 = vmatprep.subr.bf16.mxu0 %v3841_v58 }
 0x973   :  { %3570 = vmatpush3.bf16.msra.mxu1 %v3569_v24 }
 0x974   :  { %3572 = vmatprep.subr.bf16.mxu1 %v3571_v25  ;;  %3603 = vmatpush3.bf16.msra.mxu0 %v3602_v36 }
 0x975   :  { %3604 = vmatprep.subr.bf16.mxu0 %v3841_v58 }
 0x977   :  { %3574 = vmatpush3.bf16.msra.mxu1 %v3573_v17 }
 0x978   :  { %3576 = vmatprep.subr.bf16.mxu1 %v3575_v21  ;;  %3606 = vmatpush3.bf16.msra.mxu0 %v3605_v60 }
 0x979   :  { %3607 = vmatprep.subr.bf16.mxu0 %v3841_v58 }
 0x97b   :  { %3578 = vmatpush3.bf16.msra.mxu1 %v3577_v37 }
 0x97c   :  { %3580 = vmatprep.subr.bf16.mxu1 %v3579_v42  ;;  %3609 = vmatpush3.bf16.msra.mxu0 %v3608_v53 }
 0x97d   :  { %3610 = vmatprep.subr.bf16.mxu0 %v3841_v58 }
 0x97f   :  { %3582 = vmatpush3.bf16.msra.mxu1 %v3581_v3 }
 0x980   :  { %3584 = vmatprep.subr.bf16.mxu1 %v3583_v6  ;;  %3612 = vmatpush3.bf16.msra.mxu0 %v3611_v15 }
 0x981   :  { %3613 = vmatprep.subr.bf16.mxu0 %v3841_v58 }
 0x983   :  { %3586 = vmatpush3.bf16.msra.mxu1 %v3585_v50 }
 0x984   :  { %3588 = vmatprep.subr.bf16.mxu1 %v3587_v28  ;;  %3615 = vmatpush3.bf16.msra.mxu0 %v3614_v41 }
 0x985   :  { %3616 = vmatprep.subr.bf16.mxu0 %v3841_v58  ;;  %v2443_v58 = vld [vmem:[%s5120_s9 + $0x70] sm:$0xff] }
 0x986   :  { %v3593_v7 = vpack.c.bf16 %v2444_v5, %v2443_v58 }
 0x987   :  { %3590 = vmatpush3.bf16.msra.mxu1 %v3589_v40 }
 0x988   :  { %3618 = vmatpush3.bf16.msra.mxu0 %v3617_v59  ;;  %3592 = vmatprep.subr.bf16.mxu1 %v3591_v4 }
 0x98b   :  { %3594 = vmatpush3.bf16.msra.mxu1 %v3593_v7 }
 0xa1e   :  { %v2722_v62 = vpop.f32.mrb[32].mxu1 }
 0xa1f   :  { %v2723_v1 = vpop.f32.mrb[33].mxu1 }
 0xa20   :  { %v2724_v34 = vadd.f32 %v2723_v1, %v2722_v62 }
 0xa22   :  { %v2356_v19 = vadd.f32 %v2724_v34, %v2143_v12 }
 0xa3e   :  { %v2284_v20 = vpop.f32.mrb[32].mxu0  ;;  %v2425_v24 = vpop.f32.mrb[34].mxu1 }
 0xa3f   :  { %v2426_v9 = vadd.f32 %v2425_v24, %v2356_v19  ;;  %v2286_v25 = vpop.f32.mrb[33].mxu0  ;;  %v2863_v23 = vpop.f32.mrb[35].mxu1  ;;  %v3619_v36 = vadd.f32 %v2284_v20, %v2135_v31 }
 0xa40   :  { %v3620_v52 = vadd.f32 %v2286_v25, %v2139_v44 }
 0xa41   :  { %2897 = vmatmul.mubr.f32.vlgmr.msra.gmra.mrb[34].mxu0 %v2426_v9 }
 0xa42   :  { %2548 = vmatprep.mubr.f32.mxu1 %v3620_v52 }
 0xa43   :  { %2549 = vmatmul.mubr.f32.vlgmr.msra.gmra.mrb[36].mxu1 %v3619_v36 }
 0xb14   :  { %v2620_v11 = vpop.f32.mrb[34].mxu0 }
 0xb15   :  { %v2898_v30 = vpop.f32.mrb[35].mxu0 }
 0xb16   :  { %v2774_v38 = vpop.f32.mrb[36].mxu1 }
 0xb17   :  { %v2775_v10 = vpop.f32.mrb[37].mxu1 }
 0xb18   :  { %v2776_v17 = vadd.f32 %v2775_v10, %v2774_v38 }
 0xb1a   :  { %v2551_v29 = vadd.f32 %v2776_v17, %v2672_v13 }
 0xb1c   :  { %v2621_v8 = vadd.f32 %v2620_v11, %v2551_v29 }
 0xb1e   :  { %2625 = vst.msk [vmem:[%s5122_s11] sm:$0xff] %vm2624_vm9, %v2621_v8 }
 0xb1f   :  { %2630 = vsyncpa [#allocation5], 1 }
 0xb20   :  { %2631 = vsyncpa [#allocation7], 1 }

</bundles_post_ra>
